<compile_context>
chip_gen: v5e
topology: v5e:2x2
jax: 0.10.0
libtpu: 0.0.40
codegen_flags: <defaults>
</compile_context>

<pallas_src>
import functools

import jax
import jax.numpy as jnp
from jax import lax
from jax.experimental import pallas as pl
from jax.experimental.pallas import tpu as pltpu

jax.config.update("jax_default_matmul_precision", "highest")


# ---------------------------------------------------------------------------
# Kernel 1: fused node encoder   h = leaky(leaky(x@W1+b1)@W2+b2)
# ---------------------------------------------------------------------------
def _node_encoder_kernel(x_ref, w1_ref, b1_ref, w2_ref, b2_ref, o_ref):
    y = jnp.dot(x_ref[...], w1_ref[...], preferred_element_type=jnp.float32) + b1_ref[...]
    y = jnp.where(y >= 0.0, y, 0.1 * y)
    y = jnp.dot(y, w2_ref[...], preferred_element_type=jnp.float32) + b2_ref[...]
    o_ref[...] = jnp.where(y >= 0.0, y, 0.1 * y)


def pallas_node_encoder(x, enc1, enc2):
    w1, b1 = enc1
    w2, b2 = enc2
    n, nd = x.shape
    hid = w1.shape[1]
    emb = w2.shape[1]
    if n % 256 == 0:
        tn = 256
    elif n % 128 == 0:
        tn = 128
    else:
        tn = n
    return pl.pallas_call(
        _node_encoder_kernel,
        grid=(n // tn,),
        in_specs=[pl.BlockSpec((tn, nd), lambda i: (i, 0)),
                  pl.BlockSpec((nd, hid), lambda i: (0, 0)),
                  pl.BlockSpec((1, hid), lambda i: (0, 0)),
                  pl.BlockSpec((hid, emb), lambda i: (0, 0)),
                  pl.BlockSpec((1, emb), lambda i: (0, 0))],
        out_specs=pl.BlockSpec((tn, emb), lambda i: (i, 0)),
        out_shape=jax.ShapeDtypeStruct((n, emb), jnp.float32),
        compiler_params=pltpu.CompilerParams(dimension_semantics=("parallel",)),
    )(x, w1, b1.reshape(1, -1), w2, b2.reshape(1, -1))


# ---------------------------------------------------------------------------
# Kernel 2: edge embeddings for ALL layers in one wide lane-dense matmul
#   eemb_all = relu(edge_attr @ [We_0 | ... | We_{L-1}] + [be_0 | ... ])
# ---------------------------------------------------------------------------
def _edge_embed_kernel(ea_ref, w_ref, b_ref, o_ref):
    y = jnp.dot(ea_ref[...], w_ref[...], preferred_element_type=jnp.float32) + b_ref[...]
    o_ref[...] = jnp.maximum(y, 0.0)


def pallas_edge_embed(edge_attr, w_all, b_all, t_e):
    e_pad, ed = edge_attr.shape
    dout = w_all.shape[1]
    return pl.pallas_call(
        _edge_embed_kernel,
        grid=(e_pad // t_e,),
        in_specs=[pl.BlockSpec((t_e, ed), lambda i: (i, 0)),
                  pl.BlockSpec((ed, dout), lambda i: (0, 0)),
                  pl.BlockSpec((1, dout), lambda i: (0, 0))],
        out_specs=pl.BlockSpec((t_e, dout), lambda i: (i, 0)),
        out_shape=jax.ShapeDtypeStruct((e_pad, dout), jnp.float32),
        compiler_params=pltpu.CompilerParams(dimension_semantics=("parallel",)),
    )(edge_attr, w_all, b_all.reshape(1, -1))


# ---------------------------------------------------------------------------
# Kernel 3: one fully-fused GIN layer
#   grid = (E_pad // tE,)   edge-tile reduction axis ('arbitrary')
#
#   k == 0      : (if do_vn_update) vn  = vn + leaky(leaky((pool_prev+vn)@Wv1+bv1)@Wv2+bv2)
#                 vn_out = vn
#                 h_in   = h_prev + vn[batch]            (via tiny [N,G]@[G,emb])
#                 agg    = 0
#   every k     : gat  = one_hot(row_tile)               (in-register, [tE, N])
#                 sct  = one_hot(col_tile).T             (in-register, [N, tE])
#                 msg  = relu(gat @ h_in + eemb_tile)
#                 agg += sct @ msg
#   k == last   : h    = (1+eps)*h_in + agg
#                 y    = relu(h @ W1' + b1')             (BN folded into W1'/b1')
#                 h2   = y @ W2 + b2
#                 out  = leaky(LayerNorm(h2)) + h_in     (residual)
#                 pool = mean_per_graph(h_in)            (for the NEXT vn update)
# ---------------------------------------------------------------------------
def _gin_layer_kernel(row_ref, col_ref, hprev_ref, vn_ref, pool_prev_ref,
                      bsel_ref, pmean_ref, eemb_ref, eps_ref,
                      w1_ref, b1_ref, w2_ref, b2_ref, lng_ref, lnb_ref,
                      wv1_ref, bv1_ref, wv2_ref, bv2_ref,
                      hin_ref, hout_ref, pool_ref, vnout_ref,
                      agg_ref, *, do_vn_update):
    k = pl.program_id(0)
    last = pl.num_programs(0) - 1
    n_nodes = hprev_ref.shape[0]
    t_e = eemb_ref.shape[0]

    @pl.when(k == 0)
    def _prologue():
        vn = vn_ref[...]
        if do_vn_update:
            # virtual-node MLP update from the PREVIOUS layer's mean pooling,
            # fused here so it costs no extra pallas_call.
            t = pool_prev_ref[...] + vn
            y = jnp.dot(t, wv1_ref[...], preferred_element_type=jnp.float32) + bv1_ref[...]
            y = jnp.where(y >= 0.0, y, 0.1 * y)
            y = jnp.dot(y, wv2_ref[...], preferred_element_type=jnp.float32) + bv2_ref[...]
            y = jnp.where(y >= 0.0, y, 0.1 * y)
            vn = vn + y                                   # residual=True
        vnout_ref[...] = vn
        # h_in = h_prev + virtualnode_embedding[batch]
        hin_ref[...] = hprev_ref[...] + jnp.dot(
            bsel_ref[...], vn, preferred_element_type=jnp.float32)
        agg_ref[...] = jnp.zeros_like(agg_ref)

    x = hin_ref[...]

    # Gather / scatter operators for this edge tile, built in-register from the
    # int32 edge ids (never hit HBM).  Padded edges use id == n_nodes -> all-zero
    # rows/columns, so they contribute nothing to the scatter-add.
    gat = (lax.broadcasted_iota(jnp.int32, (t_e, n_nodes), 1)
           == row_ref[...]).astype(jnp.float32)                       # [tE, N]
    sct = (lax.broadcasted_iota(jnp.int32, (n_nodes, t_e), 0)
           == col_ref[...]).astype(jnp.float32)                       # [N, tE]
    msg = jnp.maximum(
        jnp.dot(gat, x, preferred_element_type=jnp.float32) + eemb_ref[...], 0.0)
    agg_ref[...] += jnp.dot(sct, msg, preferred_element_type=jnp.float32)

    @pl.when(k == last)
    def _epilogue():
        h = (1.0 + eps_ref[...]) * x + agg_ref[...]
        # GIN MLP; eval-mode BatchNorm pre-folded into w1/b1 on the host
        y = jnp.dot(h, w1_ref[...], preferred_element_type=jnp.float32) + b1_ref[...]
        y = jnp.maximum(y, 0.0)
        h2 = jnp.dot(y, w2_ref[...], preferred_element_type=jnp.float32) + b2_ref[...]
        # LayerNorm -> LeakyReLU(0.1) -> residual (+ h_in)
        mu = jnp.mean(h2, axis=-1, keepdims=True)
        var = jnp.mean((h2 - mu) ** 2, axis=-1, keepdims=True)
        yn = (h2 - mu) * lax.rsqrt(var + 1e-5) * lng_ref[...] + lnb_ref[...]
        yn = jnp.where(yn >= 0.0, yn, 0.1 * yn)
        hout_ref[...] = yn + x
        # per-graph mean pooling of h_in (global_mean_pool) for the next vn update
        pool_ref[...] = jnp.dot(pmean_ref[...], x, preferred_element_type=jnp.float32)


def pallas_gin_layer(hprev, vn, pool_prev, bsel, pmean, row_v, col_v, eemb_all,
                     layer, eps, w1f, b1f, w2, b2, ln_g, ln_b,
                     vnmlp, do_vn_update, t_e):
    n, emb = hprev.shape
    g = vn.shape[0]
    e_pad = row_v.shape[0]
    wv1, bv1, wv2, bv2 = vnmlp

    def full(shape):
        return pl.BlockSpec(shape, lambda k: (0,) * len(shape))

    in_specs = [
        pl.BlockSpec((t_e, 1), lambda k: (k, 0)),                    # row ids
        pl.BlockSpec((1, t_e), lambda k: (0, k)),                    # col ids
        full((n, emb)),                                              # h_prev (resident)
        full((g, emb)),                                              # virtual-node emb
        full((g, emb)),                                              # pooled h_in of prev layer
        full((n, g)),                                                # batch one-hot
        full((g, n)),                                                # mean-pool matrix
        pl.BlockSpec((t_e, emb), lambda k, _l=layer: (k, _l)),       # this layer's eemb slab
        full((1, 1)),                                                # eps
        full(w1f.shape), full((1, w1f.shape[1])),
        full(w2.shape), full((1, w2.shape[1])),
        full((1, emb)), full((1, emb)),
        full(wv1.shape), full((1, wv1.shape[1])),
        full(wv2.shape), full((1, wv2.shape[1])),
    ]
    out_specs = [full((n, emb)), full((n, emb)), full((g, emb)), full((g, emb))]
    out_shape = (jax.ShapeDtypeStruct((n, emb), jnp.float32),
                 jax.ShapeDtypeStruct((n, emb), jnp.float32),
                 jax.ShapeDtypeStruct((g, emb), jnp.float32),
                 jax.ShapeDtypeStruct((g, emb), jnp.float32))
    kernel = functools.partial(_gin_layer_kernel, do_vn_update=do_vn_update)
    return pl.pallas_call(
        kernel,
        grid=(e_pad // t_e,),
        in_specs=in_specs,
        out_specs=out_specs,
        out_shape=out_shape,
        scratch_shapes=[pltpu.VMEM((n, emb), jnp.float32)],
        compiler_params=pltpu.CompilerParams(dimension_semantics=("arbitrary",)),
    )(row_v, col_v, hprev, vn, pool_prev, bsel, pmean, eemb_all, eps,
      w1f, b1f.reshape(1, -1), w2, b2.reshape(1, -1),
      ln_g.reshape(1, -1), ln_b.reshape(1, -1),
      wv1, bv1.reshape(1, -1), wv2, bv2.reshape(1, -1))


# ---------------------------------------------------------------------------
# Parameter init (synthetic values; mirrors the module's shapes)
# ---------------------------------------------------------------------------
def init_params(key, node_dim, edge_dim, emb_dim, num_layer):
    def lin(k, din, dout, scale=0.1):
        k1, k2 = jax.random.split(k)
        return (scale * jax.random.normal(k1, (din, dout), jnp.float32),
                scale * jax.random.normal(k2, (dout,), jnp.float32))

    ks = iter(jax.random.split(key, 64))
    params = {}
    # node_encoder: Linear(node_dim, 2e) -> LeakyReLU(0.1) -> Linear(2e, e) -> LeakyReLU(0.1)
    params["enc1"] = lin(next(ks), node_dim, 2 * emb_dim)
    params["enc2"] = lin(next(ks), 2 * emb_dim, emb_dim)
    # virtualnode embedding (learnable parameter; random here to exercise the path)
    params["vn_emb"] = 0.1 * jax.random.normal(next(ks), (1, emb_dim), jnp.float32)

    convs, norms = [], []
    for _ in range(num_layer):
        ew, eb = lin(next(ks), edge_dim, emb_dim)
        w1, b1 = lin(next(ks), emb_dim, 2 * emb_dim)
        w2, b2 = lin(next(ks), 2 * emb_dim, emb_dim)
        kb1, kb2, kb3, kb4 = jax.random.split(next(ks), 4)
        convs.append({
            "edge_w": ew, "edge_b": eb,
            "w1": w1, "b1": b1, "w2": w2, "b2": b2,
            "bn_gamma": 1.0 + 0.1 * jax.random.normal(kb1, (2 * emb_dim,), jnp.float32),
            "bn_beta": 0.1 * jax.random.normal(kb2, (2 * emb_dim,), jnp.float32),
            "bn_mean": 0.1 * jax.random.normal(kb3, (2 * emb_dim,), jnp.float32),
            "bn_var": jax.random.uniform(kb4, (2 * emb_dim,), jnp.float32, 0.5, 1.5),
            "eps": jnp.full((1, 1), 0.05, jnp.float32),
        })
        kn1, kn2 = jax.random.split(next(ks), 2)
        norms.append((1.0 + 0.1 * jax.random.normal(kn1, (emb_dim,), jnp.float32),
                      0.1 * jax.random.normal(kn2, (emb_dim,), jnp.float32)))
    params["convs"] = convs
    params["norms"] = norms

    vn_mlps = []
    for _ in range(num_layer - 1):
        wv1, bv1 = lin(next(ks), emb_dim, 2 * emb_dim)
        wv2, bv2 = lin(next(ks), 2 * emb_dim, emb_dim)
        vn_mlps.append((wv1, bv1, wv2, bv2))
    params["vn_mlps"] = vn_mlps
    return params


# ---------------------------------------------------------------------------
# GNN_node_Virtualnode.forward  (gin / layer-norm / residual / JK='concat')
# ---------------------------------------------------------------------------
def gnn_node_virtualnode_forward(params, x, edge_index, edge_attr, batch,
                                 num_layer, num_nodes, num_graphs):
    emb = params["enc2"][0].shape[1]
    e = edge_index.shape[1]
    t_e = 128
    e_pad = max(t_e, ((e + t_e - 1) // t_e) * t_e)
    pad = e_pad - e

    row = edge_index[0].astype(jnp.int32)
    col = edge_index[1].astype(jnp.int32)
    if pad:
        # pad with an out-of-range node id: padded edges gather zeros and their
        # scatter column is empty, so they contribute nothing.
        row = jnp.concatenate([row, jnp.full((pad,), num_nodes, jnp.int32)])
        col = jnp.concatenate([col, jnp.full((pad,), num_nodes, jnp.int32)])
        edge_attr = jnp.concatenate(
            [edge_attr, jnp.zeros((pad, edge_attr.shape[1]), edge_attr.dtype)])
    row_v = row.reshape(e_pad, 1)
    col_v = col.reshape(1, e_pad)

    # tiny O(N*G) helpers for the virtual-node broadcast / mean pooling
    bsel = jax.nn.one_hot(batch, num_graphs, dtype=jnp.float32)        # [N, G]
    counts = jnp.sum(bsel, axis=0)                                     # [G]
    pmean = (bsel / counts[None, :]).T                                 # [G, N]

    # fused node encoder
    h = pallas_node_encoder(x, params["enc1"], params["enc2"])

    # all layers' edge embeddings in one lane-dense [E_pad, L*emb] matmul
    ew_all = jnp.concatenate([p["edge_w"] for p in params["convs"]], axis=1)
    eb_all = jnp.concatenate([p["edge_b"] for p in params["convs"]], axis=0)
    eemb_all = pallas_edge_embed(edge_attr, ew_all, eb_all, t_e)

    vn = jnp.broadcast_to(params["vn_emb"], (num_graphs, emb)).astype(jnp.float32)
    pool_prev = jnp.zeros((num_graphs, emb), jnp.float32)

    h_list = [h]
    for layer in range(num_layer):
        p = params["convs"][layer]
        # fold eval-mode BatchNorm into the first MLP linear (host-side)
        scale = p["bn_gamma"] * lax.rsqrt(p["bn_var"] + 1e-5)
        w1f = p["w1"] * scale[None, :]
        b1f = (p["b1"] - p["bn_mean"]) * scale + p["bn_beta"]
        ln_g, ln_b = params["norms"][layer]

        do_vn = layer > 0
        # layer 0 gets (unused) dummy vn-MLP weights so the kernel shape is fixed
        vnmlp = params["vn_mlps"][layer - 1] if do_vn else params["vn_mlps"][0]

        hin, hout, pooled, vn = pallas_gin_layer(
            h_list[layer], vn, pool_prev, bsel, pmean, row_v, col_v, eemb_all,
            layer, p["eps"], w1f, b1f, p["w2"], p["b2"], ln_g, ln_b,
            vnmlp, do_vn, t_e)

        h_list[layer] = hin            # module mutates h_list[layer] in-place
        h_list.append(hout)
        pool_prev = pooled

    return jnp.concatenate(h_list, axis=1)      # JK='concat'


# ---------------------------------------------------------------------------
# Pure-JAX reference (independent path: gather + segment_sum, unfolded BN)
# ---------------------------------------------------------------------------
def ref_forward(params, x, edge_index, edge_attr, batch, num_layer,
                num_nodes, num_graphs):
    def leaky(v):
        return jnp.where(v >= 0.0, v, 0.1 * v)

    row, col = edge_index[0], edge_index[1]
    h = leaky(x @ params["enc1"][0] + params["enc1"][1])
    h = leaky(h @ params["enc2"][0] + params["enc2"][1])
    emb = h.shape[1]
    vn = jnp.broadcast_to(params["vn_emb"], (num_graphs, emb))
    counts = jax.ops.segment_sum(jnp.ones((num_nodes,), jnp.float32), batch,
                                 num_segments=num_graphs)
    h_list = [h]
    for layer in range(num_layer):
        p = params["convs"][layer]
        hin = h_list[layer] + vn[batch]
        h_list[layer] = hin
        eemb = jnp.maximum(edge_attr @ p["edge_w"] + p["edge_b"], 0.0)
        msg = jnp.maximum(hin[row] + eemb, 0.0)
        agg = jax.ops.segment_sum(msg, col, num_segments=num_nodes)
        z = (1.0 + p["eps"][0, 0]) * hin + agg
        y = z @ p["w1"] + p["b1"]
        y = (y - p["bn_mean"]) * lax.rsqrt(p["bn_var"] + 1e-5) * p["bn_gamma"] + p["bn_beta"]
        y = jnp.maximum(y, 0.0)
        hc = y @ p["w2"] + p["b2"]
        g, b = params["norms"][layer]
        mu = jnp.mean(hc, axis=-1, keepdims=True)
        var = jnp.mean((hc - mu) ** 2, axis=-1, keepdims=True)
        hn = (hc - mu) * lax.rsqrt(var + 1e-5) * g + b
        hn = leaky(hn)
        h_list.append(hn + hin)
        if layer < num_layer - 1:
            pooled = jax.ops.segment_sum(hin, batch, num_segments=num_graphs) / counts[:, None]
            wv1, bv1, wv2, bv2 = params["vn_mlps"][layer]
            t = pooled + vn
            t = leaky(t @ wv1 + bv1)
            t = leaky(t @ wv2 + bv2)
            vn = vn + t
    return jnp.concatenate(h_list, axis=1)


# ---------------------------------------------------------------------------
if __name__ == "__main__":
    num_layer = 2
    emb_dim = 128        # lane-dense feature width (multiple of 128)
    node_dim = 16
    edge_dim = 8
    N = 64               # nodes
    E = 200              # edges (not a multiple of the 128-edge tile -> tests padding)
    G = 2                # graphs in the batch

    key = jax.random.PRNGKey(0)
    kx, kr1, kr2, kc1, kc2, kea, kp = jax.random.split(key, 7)
    x = jax.random.normal(kx, (N, node_dim), jnp.float32)
    # intra-graph edges: first graph on nodes [0, N//2), second on [N//2, N)
    row = jnp.concatenate([jax.random.randint(kr1, (E // 2,), 0, N // 2),
                           jax.random.randint(kr2, (E - E // 2,), N // 2, N)]).astype(jnp.int32)
    col = jnp.concatenate([jax.random.randint(kc1, (E // 2,), 0, N // 2),
                           jax.random.randint(kc2, (E - E // 2,), N // 2, N)]).astype(jnp.int32)
    edge_index = jnp.stack([row, col], axis=0)
    edge_attr = jax.random.normal(kea, (E, edge_dim), jnp.float32)
    batch = jnp.concatenate([jnp.zeros((N // 2,), jnp.int32),
                             jnp.ones((N - N // 2,), jnp.int32)])

    params = init_params(kp, node_dim, edge_dim, emb_dim, num_layer)

    out = gnn_node_virtualnode_forward(params, x, edge_index, edge_attr, batch,
                                       num_layer, N, G)
    out = jax.block_until_ready(out)

    ref = ref_forward(params, x, edge_index, edge_attr, batch, num_layer, N, G)
    ref = jax.block_until_ready(ref)

    assert out.shape == (N, (num_layer + 1) * emb_dim), out.shape
    max_err = float(jnp.max(jnp.abs(out - ref)))
    assert jnp.allclose(out, ref, rtol=3e-3, atol=3e-3), max_err
    print("KERNEL_OK")
</pallas_src>

<mosaic_0001>
module attributes {stable_mosaic.version = 11 : i64} {
  func.func @_node_encoder_kernel(%arg0: i32, %arg1: memref<64x16xf32, #tpu.memory_space<vmem>>, %arg2: memref<16x256xf32, #tpu.memory_space<vmem>>, %arg3: memref<1x256xf32, #tpu.memory_space<vmem>>, %arg4: memref<256x128xf32, #tpu.memory_space<vmem>>, %arg5: memref<1x128xf32, #tpu.memory_space<vmem>>, %arg6: memref<64x128xf32, #tpu.memory_space<vmem>>) attributes {dimension_semantics = [#tpu.dimension_semantics<parallel>], iteration_bounds = array<i64: 1>, scalar_prefetch = 0 : i64, scratch_operands = 0 : i64, tpu.core_type = #tpu.core_type<tc>, window_params = [{transform_indices = @transform_0, window_bounds = array<i64: 64, 16>}, {pipeline_mode = #tpu.pipeline_mode<synchronous>, transform_indices = @transform_1, window_bounds = array<i64: 16, 256>}, {pipeline_mode = #tpu.pipeline_mode<synchronous>, transform_indices = @transform_2, window_bounds = array<i64: 1, 256>}, {pipeline_mode = #tpu.pipeline_mode<synchronous>, transform_indices = @transform_3, window_bounds = array<i64: 256, 128>}, {pipeline_mode = #tpu.pipeline_mode<synchronous>, transform_indices = @transform_4, window_bounds = array<i64: 1, 128>}, {transform_indices = @transform_5, window_bounds = array<i64: 64, 128>}]} {
    %c0 = arith.constant 0 : index
    %c0_0 = arith.constant 0 : index
    %0 = vector.load %arg1[%c0, %c0_0] : memref<64x16xf32, #tpu.memory_space<vmem>>, vector<64x16xf32>
    %c0_1 = arith.constant 0 : index
    %c0_2 = arith.constant 0 : index
    %1 = vector.load %arg2[%c0_1, %c0_2] : memref<16x256xf32, #tpu.memory_space<vmem>>, vector<16x256xf32>
    %cst = arith.constant dense<0.000000e+00> : vector<64x256xf32>
    %2 = tpu.matmul %0, %1, %cst {dimension_numbers = #tpu.dot_dimension_numbers<[1], [0], [0], [1], [0, 0, 1, 1], [], []>, precision = #tpu.contract_precision<fp32>} : vector<64x16xf32>, vector<16x256xf32>, vector<64x256xf32> -> vector<64x256xf32>
    %c0_3 = arith.constant 0 : index
    %c0_4 = arith.constant 0 : index
    %3 = vector.load %arg3[%c0_3, %c0_4] : memref<1x256xf32, #tpu.memory_space<vmem>>, vector<1x256xf32>
    %4 = vector.broadcast %3 : vector<1x256xf32> to vector<64x256xf32>
    %5 = arith.addf %2, %4 : vector<64x256xf32>
    %cst_5 = arith.constant 0.000000e+00 : f32
    %6 = vector.broadcast %cst_5 : f32 to vector<64x256xf32>
    %7 = arith.cmpf oge, %5, %6 : vector<64x256xf32>
    %cst_6 = arith.constant 1.000000e-01 : f32
    %8 = vector.broadcast %cst_6 : f32 to vector<64x256xf32>
    %9 = arith.mulf %8, %5 : vector<64x256xf32>
    %10 = arith.select %7, %5, %9 : vector<64x256xi1>, vector<64x256xf32>
    %c0_7 = arith.constant 0 : index
    %c0_8 = arith.constant 0 : index
    %11 = vector.load %arg4[%c0_7, %c0_8] : memref<256x128xf32, #tpu.memory_space<vmem>>, vector<256x128xf32>
    %cst_9 = arith.constant dense<0.000000e+00> : vector<64x128xf32>
    %12 = tpu.matmul %10, %11, %cst_9 {dimension_numbers = #tpu.dot_dimension_numbers<[1], [0], [0], [1], [0, 0, 1, 1], [], []>, precision = #tpu.contract_precision<fp32>} : vector<64x256xf32>, vector<256x128xf32>, vector<64x128xf32> -> vector<64x128xf32>
    %c0_10 = arith.constant 0 : index
    %c0_11 = arith.constant 0 : index
    %13 = vector.load %arg5[%c0_10, %c0_11] : memref<1x128xf32, #tpu.memory_space<vmem>>, vector<1x128xf32>
    %14 = vector.broadcast %13 : vector<1x128xf32> to vector<64x128xf32>
    %15 = arith.addf %12, %14 : vector<64x128xf32>
    %cst_12 = arith.constant 0.000000e+00 : f32
    %16 = vector.broadcast %cst_12 : f32 to vector<64x128xf32>
    %17 = arith.cmpf oge, %15, %16 : vector<64x128xf32>
    %cst_13 = arith.constant 1.000000e-01 : f32
    %18 = vector.broadcast %cst_13 : f32 to vector<64x128xf32>
    %19 = arith.mulf %18, %15 : vector<64x128xf32>
    %20 = arith.select %17, %15, %19 : vector<64x128xi1>, vector<64x128xf32>
    %c0_14 = arith.constant 0 : index
    %c0_15 = arith.constant 0 : index
    %21 = vector.load %arg6[%c0_14, %c0_15] : memref<64x128xf32, #tpu.memory_space<vmem>>, vector<64x128xf32>
    tpu.vector_store %arg6[%c0_14, %c0_15], %20 {strides = array<i32>} : memref<64x128xf32, #tpu.memory_space<vmem>>, vector<64x128xf32>,
    return
  }
  func.func @transform_0(%arg0: i32) -> (i32, i32) {
    %c0_i32 = arith.constant 0 : i32
    %c0_i32_0 = arith.constant 0 : i32
    return %arg0, %c0_i32 : i32, i32
  }
  func.func @transform_1(%arg0: i32) -> (i32, i32) {
    %c0_i32 = arith.constant 0 : i32
    %c0_i32_0 = arith.constant 0 : i32
    %c0_i32_1 = arith.constant 0 : i32
    return %c0_i32, %c0_i32_0 : i32, i32
  }
  func.func @transform_2(%arg0: i32) -> (i32, i32) {
    %c0_i32 = arith.constant 0 : i32
    %c0_i32_0 = arith.constant 0 : i32
    %c0_i32_1 = arith.constant 0 : i32
    return %c0_i32, %c0_i32_0 : i32, i32
  }
  func.func @transform_3(%arg0: i32) -> (i32, i32) {
    %c0_i32 = arith.constant 0 : i32
    %c0_i32_0 = arith.constant 0 : i32
    %c0_i32_1 = arith.constant 0 : i32
    return %c0_i32, %c0_i32_0 : i32, i32
  }
  func.func @transform_4(%arg0: i32) -> (i32, i32) {
    %c0_i32 = arith.constant 0 : i32
    %c0_i32_0 = arith.constant 0 : i32
    %c0_i32_1 = arith.constant 0 : i32
    return %c0_i32, %c0_i32_0 : i32, i32
  }
  func.func @transform_5(%arg0: i32) -> (i32, i32) {
    %c0_i32 = arith.constant 0 : i32
    %c0_i32_0 = arith.constant 0 : i32
    return %arg0, %c0_i32 : i32, i32
  }
}

</mosaic_0001>

<bundles_post_ra>
// kernel: tpu_custom_call.1
= control target key start
LH: loop header
LB: loop body
LE: loop exit
PB: predicated region body
PF: predicated region fallthrough
CT: control target
= control target key end

     0   :  { %10 = vsyncpa [#allocation3], 0  ;;  %s3314_s0 = inlined_call_operand.vmem [shape: f32[64,16], index: 0, kind: input, shape index: {}]   ;;  %s3315_s1 = inlined_call_operand.vmem [shape: f32[16,256], index: 1, kind: input, shape index: {}]   ;;  %s3316_s2 = inlined_call_operand.vmem [shape: f32[1,256], index: 2, kind: input, shape index: {}]   ;;  %s3317_s3 = inlined_call_operand.hbm [shape: f32[256,128], index: 3, kind: input, shape index: {}]   ;;  %s3318_s4 = inlined_call_operand.vmem [shape: f32[1,128], index: 4, kind: input, shape index: {}]   ;;  %s3319_s5 = inlined_call_operand.hbm [shape: f32[64,128], index: 5, kind: output, shape index: {}]  }
   0x1   :  { %11 = vsyncpa [#allocation4], 0  ;;  %s22_s20 = sshll.u32 %s3317_s3, 4  ;;  %s2140_s21 = smov [#allocation2]   ;;  %s23_s20 = int_to_ptr.hbm [resolvable:$true] %s22_s20 }
   0x2   :  { %s24_s22 = sshll.u32 %s2140_s21, 4  ;;  %s2141_s23 = smov 128   ;;  %s25_s22 = int_to_ptr.vmem [resolvable:$true] %s24_s22 }
   0x3   :  { %s2142_s24 = smov 8  }
   0x4   :  { %30 = dma.hbm_to_vmem [thread:$0]  %s23_s20, 4096, %s25_s22, [#allocation3], %s2141_s23, %s2141_s23, %s2142_s24  }
   0x5   :  { %2136 = dma.done.wait [#allocation3], 4096  }
   0x6   :  { %2137 = vsyncadd [#allocation3], 4294963200  ;;  %vm55_vm0 = vcmask 130048   ;;  %v47_v0 = vld [vmem:[%s3315_s1 + $0x10] sm:$0xff]  ;;  %v45_v1 = vld [vmem:[%s3315_s1] sm:$0xff]  ;;  %s2070_s3 = sshll.u32 %s3319_s5, 4  ;;  %s2071_s3 = int_to_ptr.hbm [resolvable:$true] %s2070_s3 }
   0x7   :  { %v37_v2 = vld [vmem:[%s3314_s0] sm:$0xff]  ;;  %v94_v3 = vand.u32 4294901760, %v47_v0  ;;  %v2189_v4 = vand.u32 4294901760, %v45_v1  ;;  %v48_v6 = vld [vmem:[%s3315_s1 + $0x18] sm:$0xff]  ;;  %v38_v7 = vld [vmem:[%s3314_s0 + $0x8] sm:$0xff] }
   0x8   :  { %v57_v5 = vsel %vm55_vm0, %v37_v2, 0  ;;  %v2200_v9 = vand.u32 4294901760, %v48_v6  ;;  %v60_v10 = vsel %vm55_vm0, %v38_v7, 0  ;;  %v39_v11 = vld [vmem:[%s3314_s0 + $0x10] sm:$0xff]  ;;  %v46_v29 = vld [vmem:[%s3315_s1 + $0x8] sm:$0xff]  ;;  %v40_v34 = vld [vmem:[%s3314_s0 + $0x18] sm:$0xff] }
   0x9   :  { %v2198_v8 = vand.u32 4294901760, %v57_v5  ;;  %v178_v12 = vsub.f32 %v47_v0, %v94_v3  ;;  %95 = vmatpush.msra.mxu0 %v94_v3  ;;  %v184_v13 = vsub.f32 %v45_v1, %v2189_v4  ;;  %298 = vmatpush.msra.mxu3 %v94_v3  ;;  %v2207_v14 = vand.u32 4294901760, %v60_v10  ;;  %v41_v45 = vld [vmem:[%s3314_s0 + $0x20] sm:$0xff]  ;;  %v42_v53 = vld [vmem:[%s3314_s0 + $0x28] sm:$0xff]  ;;  %v43_v60 = vld [vmem:[%s3314_s0 + $0x30] sm:$0xff] }
   0xa   :  { %v554_v16 = vsub.f32 %v48_v6, %v2200_v9  ;;  %v63_v20 = vsel %vm55_vm0, %v39_v11, 0  ;;  %v472_v35 = vand.u32 4294901760, %v46_v29  ;;  %v66_v38 = vsel %vm55_vm0, %v40_v34, 0 }
   0xb   :  { %v2210_v15 = vsub.f32 %v57_v5, %v2198_v8  ;;  %238 = vmatpush.msra.mxu2 %v178_v12  ;;  %97 = vmatpush.msra.mxu0 %v2189_v4  ;;  %v179_v17 = vand.u32 4294901760, %v178_v12  ;;  %v185_v18 = vand.u32 4294901760, %v184_v13  ;;  %v2215_v19 = vsub.f32 %v60_v10, %v2207_v14 }
   0xc   :  { %300 = vmatpush.msra.mxu3 %v2189_v4  ;;  %v555_v22 = vand.u32 4294901760, %v554_v16  ;;  %v2229_v28 = vand.u32 4294901760, %v63_v20  ;;  %v560_v39 = vsub.f32 %v46_v29, %v472_v35  ;;  %v2255_v43 = vand.u32 4294901760, %v66_v38 }
   0xd   :  { %v2220_v21 = vand.u32 4294901760, %v2210_v15  ;;  %241 = vmatpush.msra.mxu2 %v184_v13  ;;  %v180_v23 = vsub.f32 %v178_v12, %v179_v17  ;;  %367 = vmatpush.msrb.mxu0 %v179_v17  ;;  %v186_v24 = vsub.f32 %v184_v13, %v185_v18  ;;  %v2227_v27 = vand.u32 4294901760, %v2215_v19 }
   0xe   :  { %244 = vmatmul.f32.vlgmr.msra.gmra.mxu2 %v2210_v15  ;;  %v556_v26 = vsub.f32 %v554_v16, %v555_v22  ;;  %v2244_v37 = vsub.f32 %v63_v20, %v2229_v28  ;;  %v561_v40 = vand.u32 4294901760, %v560_v39  ;;  %v2266_v48 = vsub.f32 %v66_v38, %v2255_v43  ;;  %v895_v20 = vld [vmem:[#allocation2 + $0x78] sm:$0xff] }
   0xf   :  { %v101_v25 = vsub.f32 %v2210_v15, %v2220_v21  ;;  %304 = vmatmul.f32.vlgmr.msra.gmra.mxu3 %v2220_v21  ;;  %471 = vmatpush.msrb.mxu2 %v2200_v9  ;;  %v181_v30 = vand.u32 4294901760, %v180_v23  ;;  %v187_v31 = vand.u32 4294901760, %v186_v24  ;;  %v109_v36 = vsub.f32 %v2215_v19, %v2227_v27  ;;  %v894_v24 = vld [vmem:[#allocation2 + $0x70] sm:$0xff] }
  0x10   :  { %371 = vmatpush.msrb.mxu0 %v185_v18  ;;  %v557_v33 = vand.u32 4294901760, %v556_v26  ;;  %v2253_v42 = vand.u32 4294901760, %v2244_v37  ;;  %v562_v44 = vsub.f32 %v560_v39, %v561_v40  ;;  %v69_v49 = vsel %vm55_vm0, %v41_v45, 0 }
  0x11   :  { %v2235_v32 = vand.u32 4294901760, %v101_v25  ;;  %182 = vmatpush.msra.mxu1 %v181_v30  ;;  %473 = vmatpush.msrb.mxu2 %v472_v35  ;;  %v2249_v41 = vand.u32 4294901760, %v109_v36  ;;  %v2274_v51 = vand.u32 4294901760, %v2266_v48  ;;  %v2276_v52 = vand.u32 4294901760, %v69_v49 }
  0x12   :  { %558 = vmatpush.msrb.mxu3 %v557_v33  ;;  %v563_v46 = vand.u32 4294901760, %v562_v44  ;;  %v117_v47 = vsub.f32 %v2244_v37, %v2253_v42  ;;  %v72_v56 = vsel %vm55_vm0, %v42_v53, 0  ;;  %v75_v63 = vsel %vm55_vm0, %v43_v60, 0 }
  0x13   :  { %103 = vmatmul.f32.vlgmr.msra.gmra.mxu0 %v2235_v32  ;;  %188 = vmatpush.msra.mxu1 %v187_v31  ;;  %v125_v54 = vsub.f32 %v2266_v48, %v2274_v51  ;;  %v2284_v55 = vsub.f32 %v69_v49, %v2276_v52  ;;  %v2293_v59 = vand.u32 4294901760, %v72_v56  ;;  %v2310_v2 = vand.u32 4294901760, %v75_v63  ;;  %v893_v31 = vld [vmem:[#allocation2 + $0x68] sm:$0xff]  ;;  %v891_v49 = vld [vmem:[#allocation2 + $0x58] sm:$0xff] }
  0x14   :  { %190 = vmatmul.f32.vlgmr.msra.gmra.mxu1 %v2198_v8  ;;  %743 = vmatpush.msra.mxu2 %v555_v22  ;;  %v118_v50 = vand.u32 4294901760, %v117_v47  ;;  %v2370_v22 = vand.u32 4294901760, %v895_v20  ;;  %v2380_v26 = vand.u32 4294901760, %v894_v24 }
  0x15   :  { %420 = vmatpush.msrb.mxu1 %v94_v3  ;;  %614 = vmatpush.msra.mxu0 %v554_v16  ;;  %v126_v57 = vand.u32 4294901760, %v125_v54  ;;  %v2291_v58 = vand.u32 4294901760, %v2284_v55  ;;  %v2301_v62 = vsub.f32 %v72_v56, %v2293_v59  ;;  %v44_v3 = vld [vmem:[%s3314_s0 + $0x38] sm:$0xff]  ;;  %v2318_v5 = vsub.f32 %v75_v63, %v2310_v2 }
  0x16   :  { %249 = vmatmul.f32.gmra.mxu2 %v2215_v19  ;;  %564 = vmatpush.msrb.mxu3 %v563_v46  ;;  %v78_v6 = vsel %vm55_vm0, %v44_v3, 0  ;;  %v2373_v23 = vsub.f32 %v895_v20, %v2370_v22  ;;  %v2387_v30 = vsub.f32 %v894_v24, %v2380_v26  ;;  %v2433_v54 = vand.u32 4294901760, %v891_v49 }
  0x17   :  { %310 = vmatmul.f32.gmra.mxu3 %v2227_v27  ;;  %422 = vmatpush.msrb.mxu1 %v2189_v4  ;;  %v133_v61 = vsub.f32 %v2284_v55, %v2291_v58  ;;  %v2308_v1 = vand.u32 4294901760, %v2301_v62  ;;  %v2327_v10 = vand.u32 4294901760, %v78_v6 }
  0x18   :  { %747 = vmatpush.msra.mxu2 %v561_v40  ;;  %617 = vmatpush.msra.mxu0 %v560_v39  ;;  %v3328_v25 = vand.u32 4294901760, %v2373_v23  ;;  %v3327_v34 = vand.u32 4294901760, %v2387_v30  ;;  %v2443_v60 = vsub.f32 %v891_v49, %v2433_v54 }
  0x19   :  { %674 = vmatpush.msra.mxu1 %v2200_v9  ;;  %796 = vmatpush.msra.mxu3 %v2200_v9  ;;  %v134_v0 = vand.u32 4294901760, %v133_v61  ;;  %v141_v4 = vsub.f32 %v2301_v62, %v2308_v1  ;;  %v2325_v9 = vand.u32 4294901760, %v2318_v5  ;;  %v2332_v12 = vsub.f32 %v78_v6, %v2327_v10  ;;  %v890_v61 = vld [vmem:[#allocation2 + $0x50] sm:$0xff]  ;;  %v889_v6 = vld [vmem:[#allocation2 + $0x48] sm:$0xff] }
  0x1a   :  { %v1016_v29 = vsub.f32 %v2373_v23, %v3328_v25  ;;  %v1022_v39 = vsub.f32 %v2387_v30, %v3327_v34  ;;  %v882_v34 = vld [vmem:[#allocation2 + $0x10] sm:$0xff] }
  0x1b   :  { %111 = vmatmul.f32.gmra.mxu0 %v2249_v41  ;;  %676 = vmatpush.msra.mxu1 %v472_v35  ;;  %v142_v7 = vand.u32 4294901760, %v141_v4  ;;  %v149_v11 = vsub.f32 %v2318_v5, %v2325_v9  ;;  %v2338_v16 = vand.u32 4294901760, %v2332_v12  ;;  %v3323_v4 = vand.u32 4294901760, %v2443_v60 }
  0x1c   :  { %194 = vmatmul.f32.gmra.mxu1 %v2207_v14  ;;  %798 = vmatpush.msra.mxu3 %v472_v35  ;;  %v1017_v33 = vand.u32 4294901760, %v1016_v29  ;;  %v2397_v35 = vand.u32 4294901760, %v893_v31  ;;  %v1023_v44 = vand.u32 4294901760, %v1022_v39  ;;  %v887_v29 = vld [vmem:[#allocation2 + $0x38] sm:$0xff] }
  0x1d   :  { %v150_v13 = vand.u32 4294901760, %v149_v11  ;;  %v157_v17 = vsub.f32 %v2332_v12, %v2338_v16  ;;  %v1040_v11 = vsub.f32 %v2443_v60, %v3323_v4  ;;  %v883_v4 = vld [vmem:[#allocation2 + $0x18] sm:$0xff] }
  0x1e   :  { %254 = vmatmul.f32.gmra.mxu2 %v2244_v37 }
  0x1f   :  { %316 = vmatmul.f32.gmra.mxu3 %v2253_v42  ;;  %v158_v18 = vand.u32 4294901760, %v157_v17  ;;  %v1041_v24 = vand.u32 4294901760, %v1040_v11 }
  0x23   :  { %119 = vmatmul.f32.gmra.mxu0 %v118_v50 }
  0x24   :  { %198 = vmatmul.f32.gmra.mxu1 %v2229_v28 }
  0x26   :  { %259 = vmatmul.f32.gmra.mxu2 %v2266_v48 }
  0x27   :  { %322 = vmatmul.f32.gmra.mxu3 %v2274_v51 }
  0x2b   :  { %127 = vmatmul.f32.gmra.mxu0 %v126_v57 }
  0x2c   :  { %202 = vmatmul.f32.gmra.mxu1 %v2255_v43 }
  0x2e   :  { %264 = vmatmul.f32.gmra.mxu2 %v2284_v55 }
  0x2f   :  { %328 = vmatmul.f32.gmra.mxu3 %v2291_v58 }
  0x33   :  { %135 = vmatmul.f32.gmra.mxu0 %v134_v0 }
  0x34   :  { %206 = vmatmul.f32.gmra.mxu1 %v2276_v52 }
  0x36   :  { %269 = vmatmul.f32.gmra.mxu2 %v2301_v62 }
  0x37   :  { %334 = vmatmul.f32.gmra.mxu3 %v2308_v1 }
  0x3b   :  { %143 = vmatmul.f32.gmra.mxu0 %v142_v7 }
  0x3c   :  { %210 = vmatmul.f32.gmra.mxu1 %v2293_v59 }
  0x3e   :  { %274 = vmatmul.f32.gmra.mxu2 %v2318_v5 }
  0x3f   :  { %340 = vmatmul.f32.gmra.mxu3 %v2325_v9 }
  0x43   :  { %151 = vmatmul.f32.gmra.mxu0 %v150_v13 }
  0x44   :  { %214 = vmatmul.f32.gmra.mxu1 %v2310_v2 }
  0x46   :  { %279 = vmatmul.f32.gmra.mxu2 %v2332_v12 }
  0x47   :  { %346 = vmatmul.f32.gmra.mxu3 %v2338_v16 }
  0x4b   :  { %159 = vmatmul.f32.gmra.mxu0 %v158_v18 }
  0x4c   :  { %218 = vmatmul.f32.gmra.mxu1 %v2327_v10 }
  0x4e   :  { %479 = vmatmul.f32.vlgmr.msrb.gmra.mxu2 %v2235_v32 }
  0x4f   :  { %566 = vmatmul.f32.vlgmr.msrb.gmra.mxu3 %v2198_v8  ;;  %1144 = vmatpush.msrb.mxu2 %v2373_v23 }
  0x50   :  { %1232 = vmatpush.msrb.mxu3 %v2370_v22 }
  0x51   :  { %1147 = vmatpush.msrb.mxu2 %v2387_v30 }
  0x52   :  { %1234 = vmatpush.msrb.mxu3 %v2380_v26 }
  0x53   :  { %373 = vmatmul.f32.vlgmr.msrb.gmra.mxu0 %v2198_v8 }
  0x54   :  { %424 = vmatmul.f32.vlgmr.msrb.gmra.mxu1 %v2198_v8  ;;  %917 = vmatpush.msrb.mxu0 %v2370_v22 }
  0x55   :  { %1018 = vmatpush.msrb.mxu1 %v1017_v33  ;;  %1236 = vmatpush.msrb.mxu3 %v2397_v35 }
  0x56   :  { %487 = vmatmul.f32.gmra.mxu2 %v2249_v41  ;;  %919 = vmatpush.msrb.mxu0 %v2380_v26  ;;  %v892_v41 = vld [vmem:[#allocation2 + $0x60] sm:$0xff] }
  0x57   :  { %570 = vmatmul.f32.gmra.mxu3 %v2207_v14  ;;  %v2416_v46 = vand.u32 4294901760, %v892_v41  ;;  %1024 = vmatpush.msrb.mxu1 %v1023_v44  ;;  %v2490_v44 = vand.u32 4294901760, %v887_v29 }
  0x58   :  { %921 = vmatpush.msrb.mxu0 %v2397_v35 }
  0x59   :  { %1238 = vmatpush.msrb.mxu3 %v2416_v46 }
  0x5a   :  { %923 = vmatpush.msrb.mxu0 %v2416_v46 }
  0x5b   :  { %377 = vmatmul.f32.gmra.mxu0 %v2207_v14  ;;  %1240 = vmatpush.msrb.mxu3 %v2433_v54 }
  0x5c   :  { %428 = vmatmul.f32.gmra.mxu1 %v2207_v14  ;;  %925 = vmatpush.msrb.mxu0 %v2433_v54 }
  0x5e   :  { %495 = vmatmul.f32.gmra.mxu2 %v118_v50 }
  0x5f   :  { %574 = vmatmul.f32.gmra.mxu3 %v2229_v28 }
  0x63   :  { %381 = vmatmul.f32.gmra.mxu0 %v2229_v28 }
  0x64   :  { %432 = vmatmul.f32.gmra.mxu1 %v2229_v28 }
  0x66   :  { %503 = vmatmul.f32.gmra.mxu2 %v126_v57 }
  0x67   :  { %578 = vmatmul.f32.gmra.mxu3 %v2255_v43 }
  0x6b   :  { %385 = vmatmul.f32.gmra.mxu0 %v2255_v43 }
  0x6c   :  { %436 = vmatmul.f32.gmra.mxu1 %v2255_v43 }
  0x6e   :  { %511 = vmatmul.f32.gmra.mxu2 %v134_v0  ;;  %v2450_v0 = vand.u32 4294901760, %v890_v61 }
  0x6f   :  { %582 = vmatmul.f32.gmra.mxu3 %v2276_v52 }
  0x70   :  { %927 = vmatpush.msrb.mxu0 %v2450_v0  ;;  %1242 = vmatpush.msrb.mxu3 %v2450_v0 }
  0x73   :  { %389 = vmatmul.f32.gmra.mxu0 %v2276_v52 }
  0x74   :  { %440 = vmatmul.f32.gmra.mxu1 %v2276_v52 }
  0x76   :  { %519 = vmatmul.f32.gmra.mxu2 %v142_v7  ;;  %v2456_v7 = vsub.f32 %v890_v61, %v2450_v0 }
  0x77   :  { %586 = vmatmul.f32.gmra.mxu3 %v2293_v59 }
  0x7b   :  { %393 = vmatmul.f32.gmra.mxu0 %v2293_v59 }
  0x7c   :  { %444 = vmatmul.f32.gmra.mxu1 %v2293_v59 }
  0x7e   :  { %527 = vmatmul.f32.gmra.mxu2 %v150_v13  ;;  %v888_v13 = vld [vmem:[#allocation2 + $0x40] sm:$0xff] }
  0x7f   :  { %590 = vmatmul.f32.gmra.mxu3 %v2310_v2 }
  0x83   :  { %397 = vmatmul.f32.gmra.mxu0 %v2310_v2 }
  0x84   :  { %448 = vmatmul.f32.gmra.mxu1 %v2310_v2 }
  0x86   :  { %535 = vmatmul.f32.gmra.mxu2 %v158_v18  ;;  %v2471_v18 = vand.u32 4294901760, %v888_v13 }
  0x87   :  { %594 = vmatmul.f32.gmra.mxu3 %v2327_v10 }
  0x88   :  { %v2483_v33 = vsub.f32 %v888_v13, %v2471_v18 }
  0x8a   :  { %v3321_v61 = vand.u32 4294901760, %v2483_v33 }
  0x8b   :  { %401 = vmatmul.f32.gmra.mxu0 %v2327_v10 }
  0x8c   :  { %452 = vmatmul.f32.gmra.mxu1 %v2327_v10  ;;  %v1058_v13 = vsub.f32 %v2483_v33, %v3321_v61 }
  0x8e   :  { %749 = vmatmul.f32.vlgmr.msra.gmra.mxu2 %v2198_v8 }
  0x8f   :  { %800 = vmatmul.f32.vlgmr.msra.gmra.mxu3 %v2198_v8  ;;  %v2407_v8 = vsub.f32 %v893_v31, %v2397_v35 }
  0x90   :  { %v2393_v32 = vpop.f32.mrf.mxu0 }
  0x91   :  { %v2399_v36 = vpop.f32.mrf.mxu1  ;;  %v2401_v38 = vpop.f32.mrf.mxu2  ;;  %1150 = vmatpush.msrb.mxu2 %v2407_v8  ;;  %v3326_v45 = vand.u32 4294901760, %v2407_v8 }
  0x92   :  { %v2411_v40 = vpop.f32.mrf.mxu3 }
  0x93   :  { %620 = vmatmul.f32.vlgmr.msra.gmra.mxu0 %v2210_v15  ;;  %v1028_v47 = vsub.f32 %v2407_v8, %v3326_v45  ;;  %v2423_v15 = vsub.f32 %v892_v41, %v2416_v46 }
  0x94   :  { %680 = vmatmul.f32.vlgmr.msra.gmra.mxu1 %v2220_v21 }
  0x95   :  { %v1029_v53 = vand.u32 4294901760, %v1028_v47  ;;  %1153 = vmatpush.msrb.mxu2 %v2423_v15  ;;  %v3324_v21 = vand.u32 4294901760, %v2423_v15  ;;  %v886_v47 = vld [vmem:[#allocation2 + $0x30] sm:$0xff] }
  0x96   :  { %753 = vmatmul.f32.gmra.mxu2 %v2207_v14 }
  0x97   :  { %804 = vmatmul.f32.gmra.mxu3 %v2207_v14  ;;  %1030 = vmatpush.msrb.mxu1 %v1029_v53  ;;  %v1034_v14 = vsub.f32 %v2423_v15, %v3324_v21 }
  0x98   :  { %v2428_v50 = vpop.f32.mrf.mxu0  ;;  %1156 = vmatpush.msrb.mxu2 %v2443_v60 }
  0x99   :  { %v2435_v56 = vpop.f32.mrf.mxu1  ;;  %v2437_v57 = vpop.f32.mrf.mxu2  ;;  %v1035_v3 = vand.u32 4294901760, %v1034_v14 }
  0x9a   :  { %v2447_v63 = vpop.f32.mrf.mxu3  ;;  %1159 = vmatpush.msrb.mxu2 %v2456_v7 }
  0x9b   :  { %625 = vmatmul.f32.gmra.mxu0 %v2215_v19  ;;  %v2459_v19 = vand.u32 4294901760, %v889_v6  ;;  %1036 = vmatpush.msrb.mxu1 %v1035_v3  ;;  %v2503_v3 = vsub.f32 %v887_v29, %v2490_v44 }
  0x9c   :  { %686 = vmatmul.f32.gmra.mxu1 %v2227_v27  ;;  %v3322_v27 = vand.u32 4294901760, %v2456_v7 }
  0x9d   :  { %v2469_v17 = vsub.f32 %v889_v6, %v2459_v19  ;;  %929 = vmatpush.msrb.mxu0 %v2459_v19  ;;  %1244 = vmatpush.msrb.mxu3 %v2459_v19  ;;  %v2505_v6 = vand.u32 4294901760, %v886_v47  ;;  %v3325_v29 = vand.u32 4294901760, %v2503_v3 }
  0x9e   :  { %757 = vmatmul.f32.gmra.mxu2 %v2229_v28  ;;  %v1046_v31 = vsub.f32 %v2456_v7, %v3322_v27  ;;  %1042 = vmatpush.msrb.mxu1 %v1041_v24 }
  0x9f   :  { %808 = vmatmul.f32.gmra.mxu3 %v2229_v28  ;;  %v3320_v28 = vand.u32 4294901760, %v2469_v17  ;;  %1162 = vmatpush.msrb.mxu2 %v2469_v17 }
  0xa0   :  { %v2473_v20 = vpop.f32.mrf.mxu0  ;;  %v1047_v53 = vand.u32 4294901760, %v1046_v31  ;;  %1246 = vmatpush.msrb.mxu3 %v2471_v18  ;;  %931 = vmatpush.msrb.mxu0 %v2471_v18  ;;  %v2517_v31 = vsub.f32 %v886_v47, %v2505_v6  ;;  %v1064_v47 = vsub.f32 %v2503_v3, %v3325_v29 }
  0xa1   :  { %v2485_v39 = vpop.f32.mrf.mxu1  ;;  %v2487_v41 = vpop.f32.mrf.mxu2  ;;  %v1052_v14 = vsub.f32 %v2469_v17, %v3320_v28  ;;  %1165 = vmatpush.msrb.mxu2 %v2483_v33  ;;  %v884_v28 = vld [vmem:[#allocation2 + $0x20] sm:$0xff] }
  0xa2   :  { %3352 = vst [vmem:[#allocation8_spill] sm:$0xff] %v2487_v41  ;;  %v2493_v49 = vpop.f32.mrf.mxu3  ;;  %1248 = vmatpush.msrb.mxu3 %v2490_v44  ;;  %1048 = vmatpush.msrb.mxu1 %v1047_v53  ;;  %v2524_v61 = vand.u32 4294901760, %v884_v28  ;;  %v3329_v53 = vand.u32 4294901760, %v2517_v31  ;;  %v1065_v29 = vand.u32 4294901760, %v1064_v47 }
  0xa3   :  { %630 = vmatmul.f32.gmra.mxu0 %v2244_v37  ;;  %3353 = vst [vmem:[#allocation9_spill] sm:$0xff] %v2493_v49  ;;  %v885_v37 = vld [vmem:[#allocation2 + $0x28] sm:$0xff]  ;;  %v1053_v11 = vand.u32 4294901760, %v1052_v14  ;;  %1168 = vmatpush.msrb.mxu2 %v2503_v3 }
  0xa4   :  { %692 = vmatmul.f32.gmra.mxu1 %v2253_v42  ;;  %v2512_v24 = vand.u32 4294901760, %v885_v37  ;;  %v1059_v42 = vand.u32 4294901760, %v1058_v13  ;;  %933 = vmatpush.msrb.mxu0 %v2490_v44  ;;  %v2539_v13 = vand.u32 4294901760, %v883_v4  ;;  %v1070_v45 = vsub.f32 %v2517_v31, %v3329_v53 }
  0xa5   :  { %1054 = vmatpush.msrb.mxu1 %v1053_v11  ;;  %1171 = vmatpush.msrb.mxu2 %v2517_v31  ;;  %v2561_v53 = vand.u32 4294901760, %v882_v34 }
  0xa6   :  { %761 = vmatmul.f32.gmra.mxu2 %v2255_v43  ;;  %v2522_v14 = vsub.f32 %v885_v37, %v2512_v24  ;;  %1250 = vmatpush.msrb.mxu3 %v2505_v6  ;;  %v2537_v37 = vsub.f32 %v884_v28, %v2524_v61  ;;  %v2558_v47 = vsub.f32 %v883_v4, %v2539_v13 }
  0xa7   :  { %812 = vmatmul.f32.gmra.mxu3 %v2255_v43  ;;  %1060 = vmatpush.msrb.mxu1 %v1059_v42 }
  0xa8   :  { %v2526_v27 = vpop.f32.mrf.mxu0  ;;  %v3330_v43 = vand.u32 4294901760, %v2522_v14  ;;  %935 = vmatpush.msrb.mxu0 %v2505_v6  ;;  %1174 = vmatpush.msrb.mxu2 %v2522_v14  ;;  %v3331_v42 = vand.u32 4294901760, %v2537_v37  ;;  %v3332_v49 = vand.u32 4294901760, %v2558_v47 }
  0xa9   :  { %v2541_v11 = vpop.f32.mrf.mxu1  ;;  %v2543_v21 = vpop.f32.mrf.mxu2  ;;  %1066 = vmatpush.msrb.mxu1 %v1065_v29  ;;  %1252 = vmatpush.msrb.mxu3 %v2512_v24  ;;  %v880_v29 = vld [vmem:[#allocation2] sm:$0xff] }
  0xaa   :  { %3354 = vst [vmem:[#allocation10_spill] sm:$0xff] %v2541_v11  ;;  %v2550_v25 = vpop.f32.mrf.mxu3  ;;  %v1076_v28 = vsub.f32 %v2522_v14, %v3330_v43  ;;  %937 = vmatpush.msrb.mxu0 %v2512_v24  ;;  %v1082_v43 = vsub.f32 %v2537_v37, %v3331_v42  ;;  %1177 = vmatpush.msrb.mxu2 %v2537_v37  ;;  %v2580_v42 = vand.u32 4294901760, %v880_v29 }
  0xab   :  { %3355 = vst [vmem:[#allocation11_spill] sm:$0xff] %v2543_v21  ;;  %635 = vmatmul.f32.gmra.mxu0 %v2266_v48  ;;  %v1071_v21 = vand.u32 4294901760, %v1070_v45  ;;  %v881_v48 = vld [vmem:[#allocation2 + $0x8] sm:$0xff]  ;;  %v2571_v45 = vsub.f32 %v882_v34, %v2561_v53  ;;  %1254 = vmatpush.msrb.mxu3 %v2524_v61 }
  0xac   :  { %3356 = vst [vmem:[#allocation12_spill] sm:$0xff] %v2550_v25  ;;  %698 = vmatmul.f32.gmra.mxu1 %v2274_v51  ;;  %v1077_v25 = vand.u32 4294901760, %v1076_v28  ;;  %v2573_v4 = vand.u32 4294901760, %v881_v48  ;;  %v1083_v51 = vand.u32 4294901760, %v1082_v43  ;;  %v1088_v28 = vsub.f32 %v2558_v47, %v3332_v49  ;;  %939 = vmatpush.msrb.mxu0 %v2524_v61 }
  0xad   :  { %1072 = vmatpush.msrb.mxu1 %v1071_v21  ;;  %v3333_v34 = vand.u32 4294901760, %v2571_v45  ;;  %1180 = vmatpush.msrb.mxu2 %v2558_v47 }
  0xae   :  { %765 = vmatmul.f32.gmra.mxu2 %v2276_v52  ;;  %v2587_v11 = vsub.f32 %v881_v48, %v2573_v4  ;;  %v1089_v41 = vand.u32 4294901760, %v1088_v28  ;;  %941 = vmatpush.msrb.mxu0 %v2539_v13 }
  0xaf   :  { %816 = vmatmul.f32.gmra.mxu3 %v2276_v52  ;;  %1078 = vmatpush.msrb.mxu1 %v1077_v25  ;;  %v2592_v52 = vsub.f32 %v880_v29, %v2580_v42  ;;  %v1094_v25 = vsub.f32 %v2571_v45, %v3333_v34 }
  0xb0   :  { %v2582_v21 = vpop.f32.mrf.mxu0  ;;  %v1099_v48 = vand.u32 4294901760, %v2587_v11  ;;  %1183 = vmatpush.msrb.mxu2 %v2571_v45  ;;  %1256 = vmatpush.msrb.mxu3 %v2539_v13 }
  0xb1   :  { %v2594_v43 = vpop.f32.mrf.mxu1  ;;  %v2596_v49 = vpop.f32.mrf.mxu2  ;;  %1084 = vmatpush.msrb.mxu1 %v1083_v51  ;;  %v1105_v29 = vand.u32 4294901760, %v2592_v52  ;;  %943 = vmatpush.msrb.mxu0 %v2561_v53 }
  0xb2   :  { %3357 = vst [vmem:[#allocation13_spill] sm:$0xff] %v2594_v43  ;;  %v2604_v28 = vpop.f32.mrf.mxu3  ;;  %v1095_v43 = vand.u32 4294901760, %v1094_v25  ;;  %v1100_v51 = vsub.f32 %v2587_v11, %v1099_v48  ;;  %1186 = vmatpush.msrb.mxu2 %v2587_v11  ;;  %1258 = vmatpush.msrb.mxu3 %v2561_v53 }
  0xb3   :  { %640 = vmatmul.f32.gmra.mxu0 %v2284_v55  ;;  %1090 = vmatpush.msrb.mxu1 %v1089_v41  ;;  %v1106_v55 = vsub.f32 %v2592_v52, %v1105_v29 }
  0xb4   :  { %704 = vmatmul.f32.gmra.mxu1 %v2291_v58  ;;  %v1101_v34 = vand.u32 4294901760, %v1100_v51  ;;  %1189 = vmatpush.msrb.mxu2 %v2592_v52 }
  0xb5   :  { %1096 = vmatpush.msrb.mxu1 %v1095_v43  ;;  %v1107_v41 = vand.u32 4294901760, %v1106_v55  ;;  %1260 = vmatpush.msrb.mxu3 %v2573_v4  ;;  %v3358_v55 = vand.u32 4294901760, %v2373_v23  ;;  %v3360_v23 = vand.u32 4294901760, %v2407_v8  ;;  %v3362_v8 = vand.u32 4294901760, %v2443_v60 }
  0xb6   :  { %769 = vmatmul.f32.gmra.mxu2 %v2293_v59  ;;  %945 = vmatpush.msrb.mxu0 %v2573_v4 }
  0xb7   :  { %820 = vmatmul.f32.gmra.mxu3 %v2293_v59  ;;  %1102 = vmatpush.msrb.mxu1 %v1101_v34  ;;  %v2636_v59 = vld [vmem:[%s3316_s2] sm:$0x3] }
  0xb8   :  { %v2620_v25 = vpop.f32.mrf.mxu0  ;;  %1262 = vmatpush.msrb.mxu3 %v2580_v42  ;;  %947 = vmatpush.msrb.mxu0 %v2580_v42 }
  0xb9   :  { %v2625_v58 = vpop.f32.mrf.mxu1  ;;  %v2627_v43 = vpop.f32.mrf.mxu2  ;;  %1108 = vmatpush.msrb.mxu1 %v1107_v41 }
  0xba   :  { %v2630_v51 = vpop.f32.mrf.mxu3  ;;  %1315 = vmatpush.msra.mxu0 %v3358_v55  ;;  %v910_v55 = vld [vmem:[#allocation2 + $0xf0] sm:$0xff] }
  0xbb   :  { %645 = vmatmul.f32.gmra.mxu0 %v2301_v62  ;;  %1410 = vmatpush.msra.mxu1 %v2370_v22  ;;  %v2644_v62 = vperm.slane %v2636_v59, 0 }
  0xbc   :  { %710 = vmatmul.f32.gmra.mxu1 %v2308_v1 }
  0xbd   :  { %1412 = vmatpush.msra.mxu1 %v2380_v26  ;;  %v3359_v26 = vand.u32 4294901760, %v2387_v30  ;;  %v105_v41 = vadd.f32 %v2393_v32, %v2644_v62  ;;  %v911_v32 = vld [vmem:[#allocation2 + $0xf8] sm:$0xff] }
  0xbe   :  { %773 = vmatmul.f32.gmra.mxu2 %v2310_v2 }
  0xbf   :  { %824 = vmatmul.f32.gmra.mxu3 %v2310_v2  ;;  %1414 = vmatpush.msra.mxu1 %v2397_v35  ;;  %v3361_v35 = vand.u32 4294901760, %v2423_v15  ;;  %v192_v30 = vadd.f32 %v2399_v36, %v105_v41  ;;  %v3363_v36 = vand.u32 4294901760, %v2456_v7  ;;  %v2715_v41 = vand.u32 4294901760, %v910_v55 }
  0xc0   :  { %v2648_v34 = vpop.f32.mrf.mxu0  ;;  %1319 = vmatpush.msra.mxu0 %v3359_v26 }
  0xc1   :  { %v2653_v22 = vpop.f32.mrf.mxu1  ;;  %v2655_v1 = vpop.f32.mrf.mxu2  ;;  %1416 = vmatpush.msra.mxu1 %v2416_v46 }
  0xc2   :  { %v2663_v2 = vpop.f32.mrf.mxu3  ;;  %1323 = vmatpush.msra.mxu0 %v3360_v23 }
  0xc3   :  { %650 = vmatmul.f32.gmra.mxu0 %v2318_v5  ;;  %1418 = vmatpush.msra.mxu1 %v2433_v54  ;;  %v113_v54 = vadd.f32 %v2428_v50, %v2644_v62  ;;  %v3365_v50 = vand.u32 4294901760, %v2483_v33 }
  0xc4   :  { %716 = vmatmul.f32.gmra.mxu1 %v2325_v9  ;;  %1327 = vmatpush.msra.mxu0 %v3361_v35  ;;  %v2680_v9 = vand.u32 4294901760, %v911_v32  ;;  %v3367_v35 = vand.u32 4294901760, %v2517_v31 }
  0xc5   :  { %1420 = vmatpush.msra.mxu1 %v2450_v0  ;;  %v196_v7 = vadd.f32 %v2435_v56, %v113_v54 }
  0xc6   :  { %777 = vmatmul.f32.gmra.mxu2 %v2327_v10  ;;  %1331 = vmatpush.msra.mxu0 %v3362_v8  ;;  %v2697_v0 = vsub.f32 %v911_v32, %v2680_v9  ;;  %v2731_v32 = vsub.f32 %v910_v55, %v2715_v41  ;;  %v3368_v8 = vand.u32 4294901760, %v2522_v14  ;;  %v3371_v55 = vld [vmem:[#allocation8_spill] sm:$0xff] }
  0xc7   :  { %828 = vmatmul.f32.gmra.mxu3 %v2327_v10  ;;  %1422 = vmatpush.msra.mxu1 %v2459_v19  ;;  %v246_v10 = vadd.f32 %v2401_v38, %v192_v30  ;;  %v3364_v19 = vand.u32 4294901760, %v2469_v17 }
  0xc8   :  { %v2675_v5 = vpop.f32.mrf.mxu0  ;;  %1335 = vmatpush.msra.mxu0 %v3363_v36  ;;  %1475 = vmatpush.msra.mxu2 %v2680_v9  ;;  %v3341_v38 = vand.u32 4294901760, %v2697_v0 }
  0xc9   :  { %v2682_v46 = vpop.f32.mrf.mxu1  ;;  %v2684_v15 = vpop.f32.mrf.mxu2  ;;  %1424 = vmatpush.msra.mxu1 %v2471_v18 }
  0xca   :  { %v2693_v60 = vpop.f32.mrf.mxu3  ;;  %1339 = vmatpush.msra.mxu0 %v3364_v19  ;;  %v1574_v17 = vsub.f32 %v2697_v0, %v3341_v38  ;;  %1477 = vmatpush.msra.mxu2 %v2715_v41 }
  0xcb   :  { %655 = vmatmul.f32.gmra.mxu0 %v2332_v12  ;;  %1426 = vmatpush.msra.mxu1 %v2490_v44  ;;  %v306_v12 = vadd.f32 %v2411_v40, %v246_v10  ;;  %v909_v44 = vld [vmem:[#allocation2 + $0xe8] sm:$0xff]  ;;  %v121_v40 = vadd.f32 %v2473_v20, %v2644_v62  ;;  %v3369_v10 = vand.u32 4294901760, %v2537_v37 }
  0xcc   :  { %722 = vmatmul.f32.gmra.mxu1 %v2338_v16  ;;  %1343 = vmatpush.msra.mxu0 %v3365_v50  ;;  %v3366_v16 = vand.u32 4294901760, %v2503_v3  ;;  %v1575_v26 = vand.u32 4294901760, %v1574_v17  ;;  %v251_v3 = vadd.f32 %v2437_v57, %v196_v7  ;;  %v3340_v57 = vand.u32 4294901760, %v2731_v32  ;;  %v907_v7 = vld [vmem:[#allocation2 + $0xd8] sm:$0xff] }
  0xcd   :  { %1428 = vmatpush.msra.mxu1 %v2505_v6  ;;  %v2717_v6 = vand.u32 4294901760, %v909_v44  ;;  %v200_v31 = vadd.f32 %v2485_v39, %v121_v40 }
  0xce   :  { %1347 = vmatpush.msra.mxu0 %v3366_v16  ;;  %1576 = vmatpush.msra.mxu3 %v1575_v26  ;;  %v312_v14 = vadd.f32 %v2447_v63, %v251_v3  ;;  %v1580_v19 = vsub.f32 %v2731_v32, %v3340_v57  ;;  %v3370_v63 = vand.u32 4294901760, %v2558_v47  ;;  %v3373_v47 = vld [vmem:[#allocation10_spill] sm:$0xff] }
  0xcf   :  { %1430 = vmatpush.msra.mxu1 %v2512_v24  ;;  %v2734_v20 = vsub.f32 %v909_v44, %v2717_v6  ;;  %1479 = vmatpush.msra.mxu2 %v2717_v6  ;;  %v256_v44 = vadd.f32 %v3371_v55, %v200_v31  ;;  %v898_v57 = vld [vmem:[#allocation2 + $0x90] sm:$0xff] }
  0xd0   :  { %v374_v18 = vpop.f32.mrf.mxu0  ;;  %1351 = vmatpush.msra.mxu0 %v3367_v35 }
  0xd1   :  { %v375_v33 = vadd.f32 %v374_v18, %v306_v12  ;;  %v425_v56 = vpop.f32.mrf.mxu1  ;;  %v2721_v23 = vpop.f32.mrf.mxu2  ;;  %1432 = vmatpush.msra.mxu1 %v2524_v61  ;;  %v3338_v36 = vand.u32 4294901760, %v2734_v20  ;;  %v908_v12 = vld [vmem:[#allocation2 + $0xe0] sm:$0xff]  ;;  %v2762_v18 = vand.u32 4294901760, %v907_v7 }
  0xd2   :  { %v2727_v30 = vpop.f32.mrf.mxu3  ;;  %1355 = vmatpush.msra.mxu0 %v3368_v8  ;;  %v2760_v17 = vand.u32 4294901760, %v908_v12  ;;  %v137_v8 = vadd.f32 %v2582_v21, %v2644_v62 }
  0xd3   :  { %v426_v24 = vadd.f32 %v425_v56, %v375_v33  ;;  %1434 = vmatpush.msra.mxu1 %v2539_v13  ;;  %v129_v13 = vadd.f32 %v2526_v27, %v2644_v62  ;;  %v1586_v37 = vsub.f32 %v2734_v20, %v3338_v36  ;;  %v2781_v31 = vsub.f32 %v907_v7, %v2762_v18 }
  0xd4   :  { %1359 = vmatpush.msra.mxu0 %v3369_v10  ;;  %1481 = vmatpush.msra.mxu2 %v2760_v17 }
  0xd5   :  { %vm832_vm1 = vcmp.ge.f32.partialorder %v426_v24, 0.0  ;;  %v848_v61 = vmul.f32 0.1, %v426_v24  ;;  %1436 = vmatpush.msra.mxu1 %v2561_v53  ;;  %v1581_v53 = vand.u32 4294901760, %v1580_v19  ;;  %v1587_v40 = vand.u32 4294901760, %v1586_v37  ;;  %v906_v19 = vld [vmem:[#allocation2 + $0xd0] sm:$0xff] }
  0xd6   :  { %1363 = vmatpush.msra.mxu0 %v3370_v63  ;;  %v204_v56 = vadd.f32 %v3373_v47, %v129_v13  ;;  %1483 = vmatpush.msra.mxu2 %v2762_v18  ;;  %v3336_v21 = vand.u32 4294901760, %v2781_v31  ;;  %v2794_v7 = vand.u32 4294901760, %v906_v19  ;;  %v3376_v63 = vld [vmem:[#allocation13_spill] sm:$0xff] }
  0xd7   :  { %v864_v54 = vsel %vm832_vm1, %v426_v24, %v848_v61  ;;  %1438 = vmatpush.msra.mxu1 %v2573_v4  ;;  %v3372_v4 = vand.u32 4294901760, %v2571_v45  ;;  %1582 = vmatpush.msra.mxu3 %v1581_v53  ;;  %v2776_v24 = vsub.f32 %v908_v12, %v2760_v17 }
  0xd8   :  { %v2752_v50 = vand.u32 4294901760, %v864_v54  ;;  %v378_v39 = vpop.f32.mrf.mxu0  ;;  %v1598_v11 = vsub.f32 %v2781_v31, %v3336_v21  ;;  %1485 = vmatpush.msra.mxu2 %v2794_v7 }
  0xd9   :  { %v379_v27 = vadd.f32 %v378_v39, %v312_v14  ;;  %v429_v33 = vpop.f32.mrf.mxu1  ;;  %v2767_v26 = vpop.f32.mrf.mxu2  ;;  %1367 = vmatpush.msra.mxu0 %v3372_v4  ;;  %1440 = vmatpush.msra.mxu1 %v2580_v42  ;;  %v3337_v10 = vand.u32 4294901760, %v2776_v24  ;;  %v3374_v14 = vld [vmem:[#allocation9_spill] sm:$0xff]  ;;  %v3375_v39 = vld [vmem:[#allocation11_spill] sm:$0xff] }
  0xda   :  { %v949_v16 = vsub.f32 %v864_v54, %v2752_v50  ;;  %1110 = vmatmul.f32.vlgmr.msrb.gmra.mxu1 %v2752_v50  ;;  %v2772_v3 = vpop.f32.mrf.mxu3  ;;  %1588 = vmatpush.msra.mxu3 %v1587_v40  ;;  %v318_v13 = vadd.f32 %v3374_v14, %v256_v44  ;;  %v261_v37 = vadd.f32 %v3375_v39, %v204_v56 }
  0xdb   :  { %v430_v35 = vadd.f32 %v429_v33, %v379_v27  ;;  %1371 = vmatpush.msra.mxu0 %v1099_v48  ;;  %v1592_v12 = vsub.f32 %v2776_v24, %v3337_v10  ;;  %1790 = vmatpush.msrb.mxu1 %v2680_v9  ;;  %v208_v27 = vadd.f32 %v3376_v63, %v137_v8  ;;  %v905_v48 = vld [vmem:[#allocation2 + $0xc8] sm:$0xff] }
  0xdc   :  { %v950_v61 = vand.u32 4294901760, %v949_v16  ;;  %1192 = vmatmul.f32.vlgmr.msrb.gmra.mxu2 %v949_v16  ;;  %v2807_v40 = vsub.f32 %v906_v19, %v2794_v7  ;;  %v2809_v4 = vand.u32 4294901760, %v905_v48 }
  0xdd   :  { %vm834_vm2 = vcmp.ge.f32.partialorder %v430_v35, 0.0  ;;  %v850_v45 = vmul.f32 0.1, %v430_v35  ;;  %1375 = vmatpush.msra.mxu0 %v1105_v29  ;;  %v1593_v33 = vand.u32 4294901760, %v1592_v12  ;;  %1792 = vmatpush.msrb.mxu1 %v2715_v41  ;;  %v1599_v29 = vand.u32 4294901760, %v1598_v11 }
  0xde   :  { %v951_v54 = vsub.f32 %v949_v16, %v950_v61  ;;  %1266 = vmatmul.f32.vlgmr.msrb.gmra.mxu3 %v950_v61  ;;  %1487 = vmatpush.msra.mxu2 %v2809_v4  ;;  %v2821_v14 = vsub.f32 %v905_v48, %v2809_v4  ;;  %v266_v12 = vadd.f32 %v2596_v49, %v208_v27  ;;  %v902_v49 = vld [vmem:[#allocation2 + $0xb0] sm:$0xff] }
  0xdf   :  { %v866_v42 = vsel %vm834_vm2, %v430_v35, %v850_v45  ;;  %v904_v35 = vld [vmem:[#allocation2 + $0xc0] sm:$0xff]  ;;  %1594 = vmatpush.msra.mxu3 %v1593_v33  ;;  %v3334_v45 = vand.u32 4294901760, %v2807_v40  ;;  %1794 = vmatpush.msrb.mxu1 %v2717_v6  ;;  %v145_v27 = vadd.f32 %v2620_v25, %v2644_v62  ;;  %v901_v25 = vld [vmem:[#allocation2 + $0xa8] sm:$0xff] }
  0xe0   :  { %v2798_v53 = vand.u32 4294901760, %v866_v42  ;;  %v382_v55 = vpop.f32.mrf.mxu0  ;;  %v952_v44 = vand.u32 4294901760, %v951_v54  ;;  %v2824_v39 = vand.u32 4294901760, %v904_v35 }
  0xe1   :  { %v383_v16 = vadd.f32 %v382_v55, %v318_v13  ;;  %v433_v47 = vpop.f32.mrf.mxu1  ;;  %v2813_v56 = vpop.f32.mrf.mxu2  ;;  %v3380_v13 = vld [vmem:[#allocation12_spill] sm:$0xff]  ;;  %1600 = vmatpush.msra.mxu3 %v1599_v29  ;;  %v1604_v55 = vsub.f32 %v2807_v40, %v3334_v45  ;;  %1796 = vmatpush.msrb.mxu1 %v2760_v17  ;;  %v2858_v45 = vand.u32 4294901760, %v901_v25 }
  0xe2   :  { %3377 = vst [vmem:[#allocation8_spill] sm:$0xff] %v2798_v53  ;;  %953 = vmatmul.f32.vlgmr.msrb.gmra.mxu0 %v952_v44  ;;  %1114 = vmatmul.f32.gmra.mxu1 %v2798_v53  ;;  %v957_v52 = vsub.f32 %v866_v42, %v2798_v53  ;;  %v2816_v61 = vpop.f32.mrf.mxu3  ;;  %v324_v54 = vadd.f32 %v3380_v13, %v261_v37  ;;  %v903_v42 = vld [vmem:[#allocation2 + $0xb8] sm:$0xff]  ;;  %v3335_v44 = vand.u32 4294901760, %v2821_v14  ;;  %v897_v53 = vld [vmem:[#allocation2 + $0x88] sm:$0xff] }
  0xe3   :  { %3378 = vst [vmem:[#allocation10_spill] sm:$0xff] %v2813_v56  ;;  %v434_v8 = vadd.f32 %v433_v47, %v383_v16  ;;  %1702 = vmatpush.msrb.mxu0 %v2697_v0  ;;  %1489 = vmatpush.msra.mxu2 %v2824_v39  ;;  %v2835_v11 = vsub.f32 %v904_v35, %v2824_v39  ;;  %v2837_v48 = vand.u32 4294901760, %v903_v42  ;;  %v1605_v33 = vand.u32 4294901760, %v1604_v55 }
  0xe4   :  { %3379 = vst [vmem:[#allocation9_spill] sm:$0xff] %v2816_v61  ;;  %1197 = vmatmul.f32.gmra.mxu2 %v957_v52  ;;  %v958_v19 = vand.u32 4294901760, %v957_v52  ;;  %v2841_v47 = vand.u32 4294901760, %v902_v49  ;;  %v1610_v35 = vsub.f32 %v2821_v14, %v3335_v44  ;;  %1798 = vmatpush.msrb.mxu1 %v2762_v18 }
  0xe5   :  { %vm836_vm3 = vcmp.ge.f32.partialorder %v434_v8, 0.0  ;;  %v852_v63 = vmul.f32 0.1, %v434_v8  ;;  %1705 = vmatpush.msrb.mxu0 %v2731_v32  ;;  %1491 = vmatpush.msra.mxu2 %v2837_v48 }
  0xe6   :  { %1272 = vmatmul.f32.gmra.mxu3 %v958_v19  ;;  %v959_v37 = vsub.f32 %v957_v52, %v958_v19  ;;  %v3339_v19 = vand.u32 4294901760, %v2835_v11  ;;  %v2856_v55 = vsub.f32 %v902_v49, %v2841_v47  ;;  %v900_v49 = vld [vmem:[#allocation2 + $0xa0] sm:$0xff]  ;;  %1800 = vmatpush.msrb.mxu1 %v2794_v7 }
  0xe7   :  { %v868_v16 = vsel %vm836_vm3, %v434_v8, %v852_v63  ;;  %1606 = vmatpush.msra.mxu3 %v1605_v33  ;;  %v2853_v63 = vsub.f32 %v903_v42, %v2837_v48  ;;  %1708 = vmatpush.msrb.mxu0 %v2734_v20  ;;  %v1611_v33 = vand.u32 4294901760, %v1610_v35  ;;  %v2877_v35 = vsub.f32 %v901_v25, %v2858_v45 }
  0xe8   :  { %v2845_v52 = vand.u32 4294901760, %v868_v16  ;;  %v386_v29 = vpop.f32.mrf.mxu0  ;;  %v960_v13 = vand.u32 4294901760, %v959_v37  ;;  %v330_v37 = vadd.f32 %v2604_v28, %v266_v12  ;;  %v1616_v42 = vsub.f32 %v2835_v11, %v3339_v19  ;;  %1493 = vmatpush.msra.mxu2 %v2841_v47  ;;  %1802 = vmatpush.msrb.mxu1 %v2809_v4 }
  0xe9   :  { %v387_v8 = vadd.f32 %v386_v29, %v324_v54  ;;  %v437_v44 = vpop.f32.mrf.mxu1  ;;  %v2863_v21 = vpop.f32.mrf.mxu2  ;;  %v212_v29 = vadd.f32 %v2625_v58, %v145_v27  ;;  %v3342_v28 = vand.u32 4294901760, %v2853_v63  ;;  %v3345_v12 = vand.u32 4294901760, %v2856_v55  ;;  %1711 = vmatpush.msrb.mxu0 %v2776_v24  ;;  %1612 = vmatpush.msra.mxu3 %v1611_v33  ;;  %v899_v58 = vld [vmem:[#allocation2 + $0x98] sm:$0xff] }
  0xea   :  { %3381 = vst [vmem:[#allocation11_spill] sm:$0xff] %v2845_v52  ;;  %961 = vmatmul.f32.gmra.mxu0 %v960_v13  ;;  %1118 = vmatmul.f32.gmra.mxu1 %v2845_v52  ;;  %v965_v54 = vsub.f32 %v868_v16, %v2845_v52  ;;  %v2870_v36 = vpop.f32.mrf.mxu3  ;;  %v1617_v13 = vand.u32 4294901760, %v1616_v42  ;;  %v2879_v19 = vand.u32 4294901760, %v900_v49  ;;  %v2897_v52 = vand.u32 4294901760, %v899_v58 }
  0xeb   :  { %3382 = vst [vmem:[#allocation13_spill] sm:$0xff] %v2863_v21  ;;  %v438_v10 = vadd.f32 %v437_v44, %v387_v8  ;;  %v153_v44 = vadd.f32 %v2648_v34, %v2644_v62  ;;  %v1622_v8 = vsub.f32 %v2853_v63, %v3342_v28  ;;  %1495 = vmatpush.msra.mxu2 %v2858_v45 }
  0xec   :  { %3383 = vst [vmem:[#allocation12_spill] sm:$0xff] %v2870_v36  ;;  %1202 = vmatmul.f32.gmra.mxu2 %v965_v54  ;;  %v966_v16 = vand.u32 4294901760, %v965_v54  ;;  %1714 = vmatpush.msrb.mxu0 %v2781_v31  ;;  %v1628_v25 = vsub.f32 %v2856_v55, %v3345_v12  ;;  %v2893_v34 = vsub.f32 %v900_v49, %v2879_v19  ;;  %v3385_v49 = vand.u32 4294901760, %v2877_v35 }
  0xed   :  { %vm838_vm4 = vcmp.ge.f32.partialorder %v438_v10, 0.0  ;;  %v854_v27 = vmul.f32 0.1, %v438_v10  ;;  %1618 = vmatpush.msra.mxu3 %v1617_v13  ;;  %v1623_v28 = vand.u32 4294901760, %v1622_v8  ;;  %1497 = vmatpush.msra.mxu2 %v2879_v19  ;;  %v271_v13 = vadd.f32 %v2627_v43, %v212_v29 }
  0xee   :  { %1278 = vmatmul.f32.gmra.mxu3 %v966_v16  ;;  %v967_v33 = vsub.f32 %v965_v54, %v966_v16  ;;  %v2899_v54 = vand.u32 4294901760, %v898_v57  ;;  %v1629_v42 = vand.u32 4294901760, %v1628_v25  ;;  %v1634_v21 = vsub.f32 %v2877_v35, %v3385_v49  ;;  %1717 = vmatpush.msrb.mxu0 %v2807_v40 }
  0xef   :  { %v870_v38 = vsel %vm838_vm4, %v438_v10, %v854_v27  ;;  %1624 = vmatpush.msra.mxu3 %v1623_v28  ;;  %1499 = vmatpush.msra.mxu2 %v2897_v52  ;;  %v2911_v27 = vsub.f32 %v899_v58, %v2897_v52  ;;  %v2920_v28 = vand.u32 4294901760, %v897_v53  ;;  %v216_v29 = vadd.f32 %v2653_v22, %v153_v44 }
  0xf0   :  { %v2901_v16 = vand.u32 4294901760, %v870_v38  ;;  %v390_v12 = vpop.f32.mrf.mxu0  ;;  %v968_v36 = vand.u32 4294901760, %v967_v33  ;;  %v2914_v8 = vsub.f32 %v898_v57, %v2899_v54  ;;  %v3388_v57 = vand.u32 4294901760, %v2893_v34  ;;  %1720 = vmatpush.msrb.mxu0 %v2821_v14  ;;  %1804 = vmatpush.msrb.mxu1 %v2824_v39 }
  0xf1   :  { %v391_v10 = vadd.f32 %v390_v12, %v330_v37  ;;  %v441_v33 = vpop.f32.mrf.mxu1  ;;  %v2917_v25 = vpop.f32.mrf.mxu2  ;;  %v1635_v37 = vand.u32 4294901760, %v1634_v21  ;;  %v896_v12 = vld [vmem:[#allocation2 + $0x80] sm:$0xff]  ;;  %1630 = vmatpush.msra.mxu3 %v1629_v42  ;;  %v3350_v56 = vand.u32 4294901760, %v2911_v27  ;;  %1501 = vmatpush.msra.mxu2 %v2899_v54  ;;  %v336_v22 = vadd.f32 %v2630_v51, %v271_v13 }
  0xf2   :  { %3384 = vst [vmem:[#allocation14_spill] sm:$0xff] %v2901_v16  ;;  %969 = vmatmul.f32.gmra.mxu0 %v968_v36  ;;  %1122 = vmatmul.f32.gmra.mxu1 %v2901_v16  ;;  %v973_v49 = vsub.f32 %v870_v38, %v2901_v16  ;;  %v2923_v58 = vpop.f32.mrf.mxu3  ;;  %v1640_v36 = vsub.f32 %v2893_v34, %v3388_v57  ;;  %v3351_v21 = vand.u32 4294901760, %v2914_v8  ;;  %v2934_v43 = vand.u32 4294901760, %v896_v12 }
  0xf3   :  { %3386 = vst [vmem:[#allocation15_spill] sm:$0xff] %v2917_v25  ;;  %v442_v61 = vadd.f32 %v441_v33, %v391_v10  ;;  %v2932_v16 = vsub.f32 %v897_v53, %v2920_v28  ;;  %1636 = vmatpush.msra.mxu3 %v1635_v37  ;;  %1503 = vmatpush.msra.mxu2 %v2920_v28 }
  0xf4   :  { %3387 = vst [vmem:[#allocation16_spill] sm:$0xff] %v2923_v58  ;;  %1207 = vmatmul.f32.gmra.mxu2 %v973_v49  ;;  %v974_v38 = vand.u32 4294901760, %v973_v49  ;;  %v1641_v10 = vand.u32 4294901760, %v1640_v36  ;;  %v1646_v57 = vsub.f32 %v2911_v27, %v3350_v56  ;;  %v1652_v53 = vsub.f32 %v2914_v8, %v3351_v21  ;;  %1723 = vmatpush.msrb.mxu0 %v2835_v11 }
  0xf5   :  { %vm840_vm5 = vcmp.ge.f32.partialorder %v442_v61, 0.0  ;;  %v856_v42 = vmul.f32 0.1, %v442_v61  ;;  %v2949_v37 = vsub.f32 %v896_v12, %v2934_v43  ;;  %1505 = vmatpush.msra.mxu2 %v2934_v43  ;;  %v3389_v21 = vand.u32 4294901760, %v2697_v0  ;;  %1806 = vmatpush.msrb.mxu1 %v2837_v48 }
  0xf6   :  { %1284 = vmatmul.f32.gmra.mxu3 %v974_v38  ;;  %v975_v33 = vsub.f32 %v973_v49, %v974_v38  ;;  %v1647_v56 = vand.u32 4294901760, %v1646_v57  ;;  %v1653_v25 = vand.u32 4294901760, %v1652_v53  ;;  %v3390_v51 = vand.u32 4294901760, %v2932_v16  ;;  %1726 = vmatpush.msrb.mxu0 %v2853_v63 }
  0xf7   :  { %v872_v44 = vsel %vm840_vm5, %v442_v61, %v856_v42  ;;  %1642 = vmatpush.msra.mxu3 %v1641_v10  ;;  %1873 = vmatpush.msrb.mxu2 %v3389_v21  ;;  %v1663_v13 = vand.u32 4294901760, %v2949_v37  ;;  %v276_v12 = vadd.f32 %v2655_v1, %v216_v29  ;;  %v161_v10 = vadd.f32 %v2675_v5, %v2644_v62 }
  0xf8   :  { %v2952_v49 = vand.u32 4294901760, %v872_v44  ;;  %v394_v36 = vpop.f32.mrf.mxu0  ;;  %v976_v38 = vand.u32 4294901760, %v975_v33  ;;  %v1658_v61 = vsub.f32 %v2932_v16, %v3390_v51  ;;  %v3391_v29 = vand.u32 4294901760, %v2731_v32  ;;  %1729 = vmatpush.msrb.mxu0 %v2856_v55  ;;  %1808 = vmatpush.msrb.mxu1 %v2841_v47 }
  0xf9   :  { %v395_v58 = vadd.f32 %v394_v36, %v336_v22  ;;  %v445_v42 = vpop.f32.mrf.mxu1  ;;  %v2964_v0 = vpop.f32.mrf.mxu2  ;;  %1648 = vmatpush.msra.mxu3 %v1647_v56  ;;  %v1664_v1 = vsub.f32 %v2949_v37, %v1663_v13  ;;  %v3392_v5 = vand.u32 4294901760, %v2734_v20  ;;  %v220_v32 = vadd.f32 %v2682_v46, %v161_v10 }
  0xfa   :  { %977 = vmatmul.f32.gmra.mxu0 %v976_v38  ;;  %1126 = vmatmul.f32.gmra.mxu1 %v2952_v49  ;;  %v981_v21 = vsub.f32 %v872_v44, %v2952_v49  ;;  %v2969_v57 = vpop.f32.mrf.mxu3  ;;  %v1659_v53 = vand.u32 4294901760, %v1658_v61  ;;  %v3393_v38 = vand.u32 4294901760, %v2776_v24 }
  0xfb   :  { %v446_v33 = vadd.f32 %v445_v42, %v395_v58  ;;  %1877 = vmatpush.msrb.mxu2 %v3391_v29  ;;  %1654 = vmatpush.msra.mxu3 %v1653_v25  ;;  %v1665_v62 = vand.u32 4294901760, %v1664_v1  ;;  %v342_v58 = vadd.f32 %v2663_v2, %v276_v12  ;;  %v3394_v42 = vand.u32 4294901760, %v2781_v31 }
  0xfc   :  { %1212 = vmatmul.f32.gmra.mxu2 %v981_v21  ;;  %v982_v22 = vand.u32 4294901760, %v981_v21  ;;  %v281_v12 = vadd.f32 %v2684_v15, %v220_v32  ;;  %1810 = vmatpush.msrb.mxu1 %v2858_v45  ;;  %v3396_v1 = vand.u32 4294901760, %v2821_v14 }
  0xfd   :  { %vm842_vm6 = vcmp.ge.f32.partialorder %v446_v33, 0.0  ;;  %v858_v44 = vmul.f32 0.1, %v446_v33  ;;  %1881 = vmatpush.msrb.mxu2 %v3392_v5  ;;  %1660 = vmatpush.msra.mxu3 %v1659_v53 }
  0xfe   :  { %1290 = vmatmul.f32.gmra.mxu3 %v982_v22  ;;  %v983_v56 = vsub.f32 %v981_v21, %v982_v22  ;;  %1732 = vmatpush.msrb.mxu0 %v2877_v35  ;;  %v3397_v22 = vand.u32 4294901760, %v2835_v11 }
  0xff   :  { %v874_v36 = vsel %vm842_vm6, %v446_v33, %v858_v44  ;;  %1885 = vmatpush.msrb.mxu2 %v3393_v38  ;;  %1666 = vmatpush.msra.mxu3 %v1665_v62  ;;  %v3395_v33 = vand.u32 4294901760, %v2807_v40  ;;  %v3007_v40 = vperm.slane %v2636_v59, 1  ;;  %v3398_v59 = vand.u32 4294901760, %v2853_v63 }
 0x100   :  { %v2984_v51 = vand.u32 4294901760, %v874_v36  ;;  %v398_v25 = vpop.f32.mrf.mxu0  ;;  %v984_v61 = vand.u32 4294901760, %v983_v56  ;;  %1812 = vmatpush.msrb.mxu1 %v2879_v19  ;;  %1735 = vmatpush.msrb.mxu0 %v2893_v34 }
 0x101   :  { %v399_v20 = vadd.f32 %v398_v25, %v342_v58  ;;  %1889 = vmatpush.msrb.mxu2 %v3394_v42  ;;  %v449_v2 = vpop.f32.mrf.mxu1  ;;  %v2991_v46 = vpop.f32.mrf.mxu2  ;;  %1968 = vmatpush.msrb.mxu3 %v2680_v9  ;;  %v348_v9 = vadd.f32 %v2693_v60, %v281_v12  ;;  %v481_v5 = vadd.f32 %v2721_v23, %v3007_v40  ;;  %v3403_v12 = vand.u32 4294901760, %v2914_v8 }
 0x102   :  { %985 = vmatmul.f32.gmra.mxu0 %v984_v61  ;;  %1130 = vmatmul.f32.gmra.mxu1 %v2984_v51  ;;  %v989_v24 = vsub.f32 %v874_v36, %v2984_v51  ;;  %v2995_v10 = vpop.f32.mrf.mxu3  ;;  %v3400_v36 = vand.u32 4294901760, %v2877_v35  ;;  %v3402_v35 = vand.u32 4294901760, %v2911_v27  ;;  %v489_v42 = vadd.f32 %v2767_v26, %v3007_v40 }
 0x103   :  { %v450_v21 = vadd.f32 %v449_v2, %v399_v20  ;;  %1893 = vmatpush.msrb.mxu2 %v3395_v33  ;;  %1970 = vmatpush.msrb.mxu3 %v2715_v41 }
 0x104   :  { %1217 = vmatmul.f32.gmra.mxu2 %v989_v24  ;;  %v990_v31 = vand.u32 4294901760, %v989_v24  ;;  %1814 = vmatpush.msrb.mxu1 %v2897_v52  ;;  %v572_v26 = vadd.f32 %v2772_v3, %v489_v42 }
 0x105   :  { %vm844_vm7 = vcmp.ge.f32.partialorder %v450_v21, 0.0  ;;  %v860_v53 = vmul.f32 0.1, %v450_v21  ;;  %1897 = vmatpush.msrb.mxu2 %v3396_v1  ;;  %1972 = vmatpush.msrb.mxu3 %v2717_v6 }
 0x106   :  { %1296 = vmatmul.f32.gmra.mxu3 %v990_v31  ;;  %v991_v15 = vsub.f32 %v989_v24, %v990_v31  ;;  %1816 = vmatpush.msrb.mxu1 %v2899_v54 }
 0x107   :  { %v876_v29 = vsel %vm844_vm7, %v450_v21, %v860_v53  ;;  %1901 = vmatpush.msrb.mxu2 %v3397_v22  ;;  %1974 = vmatpush.msrb.mxu3 %v2760_v17  ;;  %v3399_v17 = vand.u32 4294901760, %v2856_v55  ;;  %v3401_v55 = vand.u32 4294901760, %v2893_v34 }
 0x108   :  { %v3012_v44 = vand.u32 4294901760, %v876_v29  ;;  %v402_v41 = vpop.f32.mrf.mxu0  ;;  %v992_v14 = vand.u32 4294901760, %v991_v15  ;;  %1818 = vmatpush.msrb.mxu1 %v2920_v28  ;;  %1738 = vmatpush.msrb.mxu0 %v2911_v27 }
 0x109   :  { %v403_v62 = vadd.f32 %v402_v41, %v348_v9  ;;  %1905 = vmatpush.msrb.mxu2 %v3398_v59  ;;  %v453_v60 = vpop.f32.mrf.mxu1  ;;  %v3020_v6 = vpop.f32.mrf.mxu2  ;;  %1976 = vmatpush.msrb.mxu3 %v2762_v18  ;;  %v568_v18 = vadd.f32 %v2727_v30, %v481_v5  ;;  %v3407_v5 = vld [vmem:[#allocation8_spill] sm:$0xff] }
 0x10a   :  { %993 = vmatmul.f32.gmra.mxu0 %v992_v14  ;;  %1134 = vmatmul.f32.gmra.mxu1 %v3012_v44  ;;  %v997_v11 = vsub.f32 %v876_v29, %v3012_v44  ;;  %v3025_v58 = vpop.f32.mrf.mxu3 }
 0x10b   :  { %v454_v56 = vadd.f32 %v453_v60, %v403_v62  ;;  %1909 = vmatpush.msrb.mxu2 %v3399_v17  ;;  %1978 = vmatpush.msrb.mxu3 %v2794_v7 }
 0x10c   :  { %1222 = vmatmul.f32.gmra.mxu2 %v997_v11  ;;  %v998_v63 = vand.u32 4294901760, %v997_v11  ;;  %1820 = vmatpush.msrb.mxu1 %v2934_v43 }
 0x10d   :  { %vm846_vm8 = vcmp.ge.f32.partialorder %v454_v56, 0.0  ;;  %v862_v32 = vmul.f32 0.1, %v454_v56  ;;  %1913 = vmatpush.msrb.mxu2 %v3400_v36  ;;  %1980 = vmatpush.msrb.mxu3 %v2809_v4 }
 0x10e   :  { %1302 = vmatmul.f32.gmra.mxu3 %v998_v63  ;;  %v999_v23 = vsub.f32 %v997_v11, %v998_v63  ;;  %1741 = vmatpush.msrb.mxu0 %v2914_v8 }
 0x10f   :  { %v878_v38 = vsel %vm846_vm8, %v454_v56, %v862_v32  ;;  %1917 = vmatpush.msrb.mxu2 %v3401_v55  ;;  %1982 = vmatpush.msrb.mxu3 %v2824_v39 }
 0x110   :  { %v3039_v25 = vand.u32 4294901760, %v878_v38  ;;  %v621_v61 = vpop.f32.mrf.mxu0  ;;  %v1000_v20 = vand.u32 4294901760, %v999_v23  ;;  %1744 = vmatpush.msrb.mxu0 %v2932_v16 }
 0x111   :  { %v622_v7 = vadd.f32 %v621_v61, %v568_v18  ;;  %1921 = vmatpush.msrb.mxu2 %v3402_v35  ;;  %v681_v30 = vpop.f32.mrf.mxu1  ;;  %v750_v4 = vpop.f32.mrf.mxu2  ;;  %1984 = vmatpush.msrb.mxu3 %v2837_v48  ;;  %v3404_v48 = vand.u32 4294901760, %v2932_v16 }
 0x112   :  { %1001 = vmatmul.f32.gmra.mxu0 %v1000_v20  ;;  %1138 = vmatmul.f32.gmra.mxu1 %v3039_v25  ;;  %v1005_v34 = vsub.f32 %v878_v38, %v3039_v25  ;;  %v801_v24 = vpop.f32.mrf.mxu3 }
 0x113   :  { %v682_v2 = vadd.f32 %v681_v30, %v622_v7  ;;  %1986 = vmatpush.msrb.mxu3 %v2841_v47  ;;  %1925 = vmatpush.msrb.mxu2 %v3403_v12 }
 0x114   :  { %1227 = vmatmul.f32.gmra.mxu2 %v1005_v34  ;;  %v1006_v39 = vand.u32 4294901760, %v1005_v34  ;;  %1747 = vmatpush.msrb.mxu0 %v2949_v37  ;;  %v3406_v37 = vld [vmem:[#allocation9_spill] sm:$0xff] }
 0x115   :  { %v751_v27 = vadd.f32 %v750_v4, %v682_v2  ;;  %1988 = vmatpush.msrb.mxu3 %v2858_v45  ;;  %1929 = vmatpush.msrb.mxu2 %v3404_v48  ;;  %v3405_v45 = vld [vmem:[#allocation10_spill] sm:$0xff] }
 0x116   :  { %1308 = vmatmul.f32.gmra.mxu3 %v1006_v39  ;;  %v1007_v21 = vsub.f32 %v1005_v34, %v1006_v39  ;;  %v497_v16 = vadd.f32 %v3405_v45, %v3007_v40  ;;  %v3410_v34 = vld [vmem:[#allocation11_spill] sm:$0xff] }
 0x117   :  { %v802_v33 = vadd.f32 %v801_v24, %v751_v27  ;;  %1990 = vmatpush.msrb.mxu3 %v2879_v19  ;;  %1933 = vmatpush.msrb.mxu2 %v1663_v13  ;;  %v3411_v24 = vld [vmem:[#allocation15_spill] sm:$0xff] }
 0x118   :  { %v626_v31 = vpop.f32.mrf.mxu0  ;;  %v1008_v53 = vand.u32 4294901760, %v1007_v21  ;;  %v576_v13 = vadd.f32 %v3406_v37, %v497_v16  ;;  %v513_v39 = vadd.f32 %v3411_v24, %v3007_v40  ;;  %v521_v37 = vadd.f32 %v2964_v0, %v3007_v40 }
 0x119   :  { %vm833_vm9 = vcmp.ge.f32.partialorder %v802_v33, 0.0  ;;  %v849_v47 = vmul.f32 0.1, %v802_v33  ;;  %v627_v8 = vadd.f32 %v626_v31, %v572_v26  ;;  %v687_v1 = vpop.f32.mrf.mxu1  ;;  %v754_v3 = vpop.f32.mrf.mxu2  ;;  %1992 = vmatpush.msrb.mxu3 %v2897_v52 }
 0x11a   :  { %1009 = vmatmul.f32.gmra.mxu0 %v1008_v53  ;;  %1442 = vmatmul.f32.vlgmr.msra.gmra.mxu1 %v2752_v50  ;;  %v805_v29 = vpop.f32.mrf.mxu3  ;;  %v3412_v53 = vld [vmem:[#allocation16_spill] sm:$0xff] }
 0x11b   :  { %v865_v15 = vsel %vm833_vm9, %v802_v33, %v849_v47  ;;  %v688_v9 = vadd.f32 %v687_v1, %v627_v8  ;;  %1994 = vmatpush.msrb.mxu3 %v2899_v54  ;;  %v584_v47 = vadd.f32 %v3412_v53, %v513_v39 }
 0x11c   :  { %v3069_v22 = vand.u32 4294901760, %v865_v15 }
 0x11d   :  { %v755_v41 = vadd.f32 %v754_v3, %v688_v9  ;;  %1996 = vmatpush.msrb.mxu3 %v2920_v28  ;;  %v3408_v28 = vld [vmem:[#allocation13_spill] sm:$0xff]  ;;  %v3413_v9 = vld [vmem:[#allocation14_spill] sm:$0xff] }
 0x11e   :  { %v3073_v19 = vsub.f32 %v865_v15, %v3069_v22  ;;  %1668 = vmatmul.f32.vlgmr.msra.gmra.mxu3 %v3069_v22  ;;  %v505_v17 = vadd.f32 %v3408_v28, %v3007_v40 }
 0x11f   :  { %v806_v14 = vadd.f32 %v805_v29, %v755_v41  ;;  %1998 = vmatpush.msrb.mxu3 %v2934_v43 }
 0x120   :  { %v1508_v62 = vand.u32 4294901760, %v3073_v19  ;;  %v631_v59 = vpop.f32.mrf.mxu0 }
 0x121   :  { %vm835_vm10 = vcmp.ge.f32.partialorder %v806_v14, 0.0  ;;  %v851_v52 = vmul.f32 0.1, %v806_v14  ;;  %v632_v60 = vadd.f32 %v631_v59, %v576_v13  ;;  %v693_v11 = vpop.f32.mrf.mxu1  ;;  %v758_v56 = vpop.f32.mrf.mxu2 }
 0x122   :  { %v1509_v54 = vsub.f32 %v3073_v19, %v1508_v62  ;;  %1377 = vmatmul.f32.vlgmr.msra.gmra.mxu0 %v2752_v50  ;;  %1446 = vmatmul.f32.gmra.mxu1 %v3407_v5  ;;  %v809_v36 = vpop.f32.mrf.mxu3  ;;  %v3409_v50 = vld [vmem:[#allocation12_spill] sm:$0xff] }
 0x123   :  { %v867_v63 = vsel %vm835_vm10, %v806_v14, %v851_v52  ;;  %v694_v32 = vadd.f32 %v693_v11, %v632_v60  ;;  %v580_v55 = vadd.f32 %v3409_v50, %v505_v17 }
 0x124   :  { %v3087_v23 = vand.u32 4294901760, %v867_v63  ;;  %v1510_v18 = vand.u32 4294901760, %v1509_v54 }
 0x125   :  { %v759_v43 = vadd.f32 %v758_v56, %v694_v32 }
 0x126   :  { %v3090_v38 = vsub.f32 %v867_v63, %v3087_v23  ;;  %1511 = vmatmul.f32.vlgmr.msra.gmra.mxu2 %v1510_v18  ;;  %1672 = vmatmul.f32.gmra.mxu3 %v3087_v23 }
 0x127   :  { %v810_v61 = vadd.f32 %v809_v36, %v759_v43 }
 0x128   :  { %v636_v20 = vpop.f32.mrf.mxu0  ;;  %v1516_v7 = vand.u32 4294901760, %v3090_v38 }
 0x129   :  { %vm837_vm11 = vcmp.ge.f32.partialorder %v810_v61, 0.0  ;;  %v853_v35 = vmul.f32 0.1, %v810_v61  ;;  %v637_v30 = vadd.f32 %v636_v20, %v580_v55  ;;  %v699_v4 = vpop.f32.mrf.mxu1  ;;  %v762_v42 = vpop.f32.mrf.mxu2 }
 0x12a   :  { %1381 = vmatmul.f32.gmra.mxu0 %v3407_v5  ;;  %1450 = vmatmul.f32.gmra.mxu1 %v3410_v34  ;;  %v1517_v2 = vsub.f32 %v3090_v38, %v1516_v7  ;;  %v813_v21 = vpop.f32.mrf.mxu3  ;;  %v588_v5 = vadd.f32 %v2969_v57, %v521_v37  ;;  %v529_v57 = vadd.f32 %v2991_v46, %v3007_v40 }
 0x12b   :  { %v869_v27 = vsel %vm837_vm11, %v810_v61, %v853_v35  ;;  %v700_v12 = vadd.f32 %v699_v4, %v637_v30 }
 0x12c   :  { %v3102_v26 = vand.u32 4294901760, %v869_v27  ;;  %v1518_v33 = vand.u32 4294901760, %v1517_v2  ;;  %v592_v4 = vadd.f32 %v2995_v10, %v529_v57  ;;  %v537_v10 = vadd.f32 %v3020_v6, %v3007_v40 }
 0x12d   :  { %v763_v48 = vadd.f32 %v762_v42, %v700_v12 }
 0x12e   :  { %v3105_v31 = vsub.f32 %v869_v27, %v3102_v26  ;;  %1519 = vmatmul.f32.gmra.mxu2 %v1518_v33  ;;  %1676 = vmatmul.f32.gmra.mxu3 %v3102_v26 }
 0x12f   :  { %v814_v8 = vadd.f32 %v813_v21, %v763_v48 }
 0x130   :  { %v641_v1 = vpop.f32.mrf.mxu0  ;;  %v1524_v3 = vand.u32 4294901760, %v3105_v31 }
 0x131   :  { %vm839_vm12 = vcmp.ge.f32.partialorder %v814_v8, 0.0  ;;  %v855_v45 = vmul.f32 0.1, %v814_v8  ;;  %v642_v16 = vadd.f32 %v641_v1, %v584_v47  ;;  %v705_v15 = vpop.f32.mrf.mxu1  ;;  %v766_v29 = vpop.f32.mrf.mxu2 }
 0x132   :  { %1385 = vmatmul.f32.gmra.mxu0 %v3410_v34  ;;  %1454 = vmatmul.f32.gmra.mxu1 %v3413_v9  ;;  %v1525_v41 = vsub.f32 %v3105_v31, %v1524_v3  ;;  %v817_v59 = vpop.f32.mrf.mxu3 }
 0x133   :  { %v871_v13 = vsel %vm839_vm12, %v814_v8, %v855_v45  ;;  %v706_v14 = vadd.f32 %v705_v15, %v642_v16 }
 0x134   :  { %v3117_v52 = vand.u32 4294901760, %v871_v13  ;;  %v1526_v60 = vand.u32 4294901760, %v1525_v41 }
 0x135   :  { %v767_v54 = vadd.f32 %v766_v29, %v706_v14 }
 0x136   :  { %v3120_v11 = vsub.f32 %v871_v13, %v3117_v52  ;;  %1527 = vmatmul.f32.gmra.mxu2 %v1526_v60  ;;  %1680 = vmatmul.f32.gmra.mxu3 %v3117_v52 }
 0x137   :  { %v818_v56 = vadd.f32 %v817_v59, %v767_v54 }
 0x138   :  { %v646_v28 = vpop.f32.mrf.mxu0  ;;  %v1532_v17 = vand.u32 4294901760, %v3120_v11 }
 0x139   :  { %vm841_vm13 = vcmp.ge.f32.partialorder %v818_v56, 0.0  ;;  %v857_v0 = vmul.f32 0.1, %v818_v56  ;;  %v647_v63 = vadd.f32 %v646_v28, %v588_v5  ;;  %v711_v32 = vpop.f32.mrf.mxu1  ;;  %v770_v36 = vpop.f32.mrf.mxu2 }
 0x13a   :  { %1389 = vmatmul.f32.gmra.mxu0 %v3413_v9  ;;  %1458 = vmatmul.f32.gmra.mxu1 %v2952_v49  ;;  %v1533_v18 = vsub.f32 %v3120_v11, %v1532_v17  ;;  %v821_v55 = vpop.f32.mrf.mxu3 }
 0x13b   :  { %v873_v43 = vsel %vm841_vm13, %v818_v56, %v857_v0  ;;  %v712_v50 = vadd.f32 %v711_v32, %v647_v63 }
 0x13c   :  { %v3132_v61 = vand.u32 4294901760, %v873_v43  ;;  %v1534_v20 = vand.u32 4294901760, %v1533_v18 }
 0x13d   :  { %v771_v35 = vadd.f32 %v770_v36, %v712_v50  ;;  %v3188_v50 = vld [vmem:[%s3318_s4] ss:$0 sm:$0xff]  ;;  %s2143_s4 = smov [#allocation5]  }
 0x13e   :  { %v3135_v30 = vsub.f32 %v873_v43, %v3132_v61  ;;  %1535 = vmatmul.f32.gmra.mxu2 %v1534_v20  ;;  %1684 = vmatmul.f32.gmra.mxu3 %v3132_v61  ;;  %s2068_s26 = sshll.u32 %s2143_s4, 4  ;;  %s2069_s26 = int_to_ptr.vmem [resolvable:$true] %s2068_s26 }
 0x13f   :  { %v822_v34 = vadd.f32 %v821_v55, %v771_v35 }
 0x140   :  { %v651_v42 = vpop.f32.mrf.mxu0  ;;  %v1540_v2 = vand.u32 4294901760, %v3135_v30 }
 0x141   :  { %vm843_vm14 = vcmp.ge.f32.partialorder %v822_v34, 0.0  ;;  %v859_v46 = vmul.f32 0.1, %v822_v34  ;;  %v652_v24 = vadd.f32 %v651_v42, %v592_v4  ;;  %v717_v39 = vpop.f32.mrf.mxu1  ;;  %v774_v27 = vpop.f32.mrf.mxu2 }
 0x142   :  { %1393 = vmatmul.f32.gmra.mxu0 %v2952_v49  ;;  %1462 = vmatmul.f32.gmra.mxu1 %v2984_v51  ;;  %v1541_v12 = vsub.f32 %v3135_v30, %v1540_v2  ;;  %v825_v48 = vpop.f32.mrf.mxu3  ;;  %v596_v49 = vadd.f32 %v3025_v58, %v537_v10 }
 0x143   :  { %v875_v21 = vsel %vm843_vm14, %v822_v34, %v859_v46  ;;  %v718_v33 = vadd.f32 %v717_v39, %v652_v24 }
 0x144   :  { %v3147_v53 = vand.u32 4294901760, %v875_v21  ;;  %v1542_v47 = vand.u32 4294901760, %v1541_v12 }
 0x145   :  { %v775_v8 = vadd.f32 %v774_v27, %v718_v33 }
 0x146   :  { %v3150_v1 = vsub.f32 %v875_v21, %v3147_v53  ;;  %1543 = vmatmul.f32.gmra.mxu2 %v1542_v47  ;;  %1688 = vmatmul.f32.gmra.mxu3 %v3147_v53 }
 0x147   :  { %v826_v45 = vadd.f32 %v825_v48, %v775_v8 }
 0x148   :  { %v656_v16 = vpop.f32.mrf.mxu0  ;;  %v1548_v15 = vand.u32 4294901760, %v3150_v1 }
 0x149   :  { %vm845_vm15 = vcmp.ge.f32.partialorder %v826_v45, 0.0  ;;  %v861_v40 = vmul.f32 0.1, %v826_v45  ;;  %v657_v6 = vadd.f32 %v656_v16, %v596_v49  ;;  %v723_v9 = vpop.f32.mrf.mxu1  ;;  %v778_v29 = vpop.f32.mrf.mxu2 }
 0x14a   :  { %1397 = vmatmul.f32.gmra.mxu0 %v2984_v51  ;;  %1466 = vmatmul.f32.gmra.mxu1 %v3012_v44  ;;  %v1549_v41 = vsub.f32 %v3150_v1, %v1548_v15  ;;  %v829_v14 = vpop.f32.mrf.mxu3 }
 0x14b   :  { %v877_v37 = vsel %vm845_vm15, %v826_v45, %v861_v40  ;;  %v724_v13 = vadd.f32 %v723_v9, %v657_v6 }
 0x14c   :  { %v3160_v58 = vand.u32 4294901760, %v877_v37  ;;  %v1550_v59 = vand.u32 4294901760, %v1549_v41 }
 0x14d   :  { %v779_v60 = vadd.f32 %v778_v29, %v724_v13 }
 0x14e   :  { %v3163_v54 = vsub.f32 %v877_v37, %v3160_v58  ;;  %1551 = vmatmul.f32.gmra.mxu2 %v1550_v59  ;;  %1692 = vmatmul.f32.gmra.mxu3 %v3160_v58 }
 0x14f   :  { %v830_v51 = vadd.f32 %v829_v14, %v779_v60 }
 0x150   :  { %v1556_v5 = vand.u32 4294901760, %v3163_v54 }
 0x151   :  { %vm847_vm0 = vcmp.ge.f32.partialorder %v830_v51, 0.0  ;;  %v863_v56 = vmul.f32 0.1, %v830_v51 }
 0x152   :  { %1401 = vmatmul.f32.gmra.mxu0 %v3012_v44  ;;  %1470 = vmatmul.f32.gmra.mxu1 %v3039_v25  ;;  %v1557_v28 = vsub.f32 %v3163_v54, %v1556_v5 }
 0x153   :  { %v879_v0 = vsel %vm847_vm0, %v830_v51, %v863_v56 }
 0x154   :  { %v3172_v63 = vand.u32 4294901760, %v879_v0  ;;  %v1558_v32 = vand.u32 4294901760, %v1557_v28 }
 0x156   :  { %v3175_v36 = vsub.f32 %v879_v0, %v3172_v63  ;;  %1559 = vmatmul.f32.gmra.mxu2 %v1558_v32  ;;  %1696 = vmatmul.f32.gmra.mxu3 %v3172_v63 }
 0x157   :  { %v1111_v18 = vpop.f32.mrf.mxu1 }
 0x158   :  { %v1564_v57 = vand.u32 4294901760, %v3175_v36 }
 0x15a   :  { %1405 = vmatmul.f32.gmra.mxu0 %v3039_v25  ;;  %1824 = vmatmul.f32.vlgmr.msrb.gmra.mxu1 %v1508_v62  ;;  %v1565_v44 = vsub.f32 %v3175_v36, %v1564_v57 }
 0x15c   :  { %v1566_v43 = vand.u32 4294901760, %v1565_v44 }
 0x15e   :  { %1567 = vmatmul.f32.gmra.mxu2 %v1566_v43  ;;  %2000 = vmatmul.f32.vlgmr.msrb.gmra.mxu3 %v3069_v22 }
 0x15f   :  { %v954_v55 = vpop.f32.mrf.mxu0  ;;  %v1115_v20 = vpop.f32.mrf.mxu1 }
 0x160   :  { %v955_v25 = vadd.f32 %v3188_v50, %v954_v55  ;;  %v1193_v35 = vpop.f32.mrf.mxu2 }
 0x161   :  { %v1267_v4 = vpop.f32.mrf.mxu3 }
 0x162   :  { %v1112_v62 = vadd.f32 %v1111_v18, %v955_v25  ;;  %1750 = vmatmul.f32.vlgmr.msrb.gmra.mxu0 %v3073_v19  ;;  %1830 = vmatmul.f32.gmra.mxu1 %v1516_v7 }
 0x164   :  { %v1194_v34 = vadd.f32 %v1193_v35, %v1112_v62 }
 0x166   :  { %v3195_v42 = vadd.f32 %v1267_v4, %v1194_v34  ;;  %1935 = vmatmul.f32.vlgmr.msrb.gmra.mxu2 %v3069_v22  ;;  %2004 = vmatmul.f32.gmra.mxu3 %v3087_v23 }
 0x167   :  { %v962_v46 = vpop.f32.mrf.mxu0  ;;  %v1119_v24 = vpop.f32.mrf.mxu1 }
 0x168   :  { %v963_v39 = vadd.f32 %v3188_v50, %v962_v46  ;;  %v1198_v27 = vpop.f32.mrf.mxu2 }
 0x169   :  { %v1273_v12 = vpop.f32.mrf.mxu3 }
 0x16a   :  { %v1116_v10 = vadd.f32 %v1115_v20, %v963_v39  ;;  %1755 = vmatmul.f32.gmra.mxu0 %v3090_v38  ;;  %1836 = vmatmul.f32.gmra.mxu1 %v1524_v3 }
 0x16c   :  { %v1199_v19 = vadd.f32 %v1198_v27, %v1116_v10 }
 0x16e   :  { %v3203_v7 = vadd.f32 %v1273_v12, %v1199_v19  ;;  %1939 = vmatmul.f32.gmra.mxu2 %v3087_v23  ;;  %2008 = vmatmul.f32.gmra.mxu3 %v3102_v26 }
 0x16f   :  { %v970_v22 = vpop.f32.mrf.mxu0  ;;  %v1123_v21 = vpop.f32.mrf.mxu1 }
 0x170   :  { %v971_v33 = vadd.f32 %v3188_v50, %v970_v22  ;;  %v1203_v48 = vpop.f32.mrf.mxu2 }
 0x171   :  { %v1279_v47 = vpop.f32.mrf.mxu3 }
 0x172   :  { %v1120_v8 = vadd.f32 %v1119_v24, %v971_v33  ;;  %1760 = vmatmul.f32.gmra.mxu0 %v3105_v31  ;;  %1842 = vmatmul.f32.gmra.mxu1 %v1532_v17 }
 0x174   :  { %v1204_v38 = vadd.f32 %v1203_v48, %v1120_v8 }
 0x176   :  { %v3211_v3 = vadd.f32 %v1279_v47, %v1204_v38  ;;  %1943 = vmatmul.f32.gmra.mxu2 %v3102_v26  ;;  %2012 = vmatmul.f32.gmra.mxu3 %v3117_v52 }
 0x177   :  { %v978_v23 = vpop.f32.mrf.mxu0  ;;  %v1127_v49 = vpop.f32.mrf.mxu1 }
 0x178   :  { %v979_v45 = vadd.f32 %v3188_v50, %v978_v23  ;;  %v1208_v16 = vpop.f32.mrf.mxu2 }
 0x179   :  { %v1285_v40 = vpop.f32.mrf.mxu3 }
 0x17a   :  { %v1124_v6 = vadd.f32 %v1123_v21, %v979_v45  ;;  %1765 = vmatmul.f32.gmra.mxu0 %v3120_v11  ;;  %1848 = vmatmul.f32.gmra.mxu1 %v1540_v2 }
 0x17c   :  { %v1209_v31 = vadd.f32 %v1208_v16, %v1124_v6 }
 0x17e   :  { %v3219_v17 = vadd.f32 %v1285_v40, %v1209_v31  ;;  %1947 = vmatmul.f32.gmra.mxu2 %v3117_v52  ;;  %2016 = vmatmul.f32.gmra.mxu3 %v3132_v61 }
 0x17f   :  { %v986_v26 = vpop.f32.mrf.mxu0  ;;  %v1131_v9 = vpop.f32.mrf.mxu1 }
 0x180   :  { %v987_v29 = vadd.f32 %v3188_v50, %v986_v26  ;;  %v1213_v41 = vpop.f32.mrf.mxu2 }
 0x181   :  { %v1291_v37 = vpop.f32.mrf.mxu3 }
 0x182   :  { %v1128_v13 = vadd.f32 %v1127_v49, %v987_v29  ;;  %1770 = vmatmul.f32.gmra.mxu0 %v3135_v30  ;;  %1854 = vmatmul.f32.gmra.mxu1 %v1548_v15 }
 0x184   :  { %v1214_v11 = vadd.f32 %v1213_v41, %v1128_v13 }
 0x186   :  { %v3227_v2 = vadd.f32 %v1291_v37, %v1214_v11  ;;  %1951 = vmatmul.f32.gmra.mxu2 %v3132_v61  ;;  %2020 = vmatmul.f32.gmra.mxu3 %v3147_v53 }
 0x187   :  { %v994_v52 = vpop.f32.mrf.mxu0  ;;  %v1135_v14 = vpop.f32.mrf.mxu1 }
 0x188   :  { %v995_v59 = vadd.f32 %v3188_v50, %v994_v52  ;;  %v1218_v60 = vpop.f32.mrf.mxu2 }
 0x189   :  { %v1297_v51 = vpop.f32.mrf.mxu3 }
 0x18a   :  { %v1132_v56 = vadd.f32 %v1131_v9, %v995_v59  ;;  %1775 = vmatmul.f32.gmra.mxu0 %v3150_v1  ;;  %1860 = vmatmul.f32.gmra.mxu1 %v1556_v5 }
 0x18c   :  { %v1219_v30 = vadd.f32 %v1218_v60, %v1132_v56 }
 0x18e   :  { %v3235_v15 = vadd.f32 %v1297_v51, %v1219_v30  ;;  %1955 = vmatmul.f32.gmra.mxu2 %v3147_v53  ;;  %2024 = vmatmul.f32.gmra.mxu3 %v3160_v58 }
 0x18f   :  { %v1002_v61 = vpop.f32.mrf.mxu0  ;;  %v1139_v28 = vpop.f32.mrf.mxu1 }
 0x190   :  { %v1003_v0 = vadd.f32 %v3188_v50, %v1002_v61  ;;  %v1223_v32 = vpop.f32.mrf.mxu2 }
 0x191   :  { %v1303_v18 = vpop.f32.mrf.mxu3 }
 0x192   :  { %v1136_v44 = vadd.f32 %v1135_v14, %v1003_v0  ;;  %1780 = vmatmul.f32.gmra.mxu0 %v3163_v54  ;;  %1866 = vmatmul.f32.gmra.mxu1 %v1564_v57 }
 0x194   :  { %v1224_v1 = vadd.f32 %v1223_v32, %v1136_v44 }
 0x196   :  { %v3243_v5 = vadd.f32 %v1303_v18, %v1224_v1  ;;  %1959 = vmatmul.f32.gmra.mxu2 %v3160_v58  ;;  %2028 = vmatmul.f32.gmra.mxu3 %v3172_v63 }
 0x197   :  { %v1010_v53 = vpop.f32.mrf.mxu0  ;;  %v1443_v43 = vpop.f32.mrf.mxu1 }
 0x198   :  { %v1011_v55 = vadd.f32 %v3188_v50, %v1010_v53  ;;  %v1228_v35 = vpop.f32.mrf.mxu2 }
 0x199   :  { %v1309_v20 = vpop.f32.mrf.mxu3 }
 0x19a   :  { %v1140_v25 = vadd.f32 %v1139_v28, %v1011_v55  ;;  %1785 = vmatmul.f32.gmra.mxu0 %v3175_v36 }
 0x19c   :  { %v1229_v54 = vadd.f32 %v1228_v35, %v1140_v25 }
 0x19e   :  { %v3249_v4 = vadd.f32 %v1309_v20, %v1229_v54  ;;  %1963 = vmatmul.f32.gmra.mxu2 %v3172_v63 }
 0x19f   :  { %v1378_v57 = vpop.f32.mrf.mxu0  ;;  %v1447_v62 = vpop.f32.mrf.mxu1 }
 0x1a0   :  { %v1379_v26 = vadd.f32 %v1378_v57, %v3195_v42 }
 0x1a1   :  { %v1669_v34 = vpop.f32.mrf.mxu3 }
 0x1a2   :  { %v1444_v37 = vadd.f32 %v1443_v43, %v1379_v26 }
 0x1a7   :  { %v1382_v58 = vpop.f32.mrf.mxu0  ;;  %v1451_v46 = vpop.f32.mrf.mxu1 }
 0x1a8   :  { %v1383_v52 = vadd.f32 %v1382_v58, %v3203_v7 }
 0x1a9   :  { %v1512_v24 = vpop.f32.mrf.mxu2  ;;  %v1673_v39 = vpop.f32.mrf.mxu3 }
 0x1aa   :  { %v1513_v13 = vadd.f32 %v1512_v24, %v1444_v37  ;;  %v1448_v56 = vadd.f32 %v1447_v62, %v1383_v52 }
 0x1ac   :  { %v1670_v60 = vadd.f32 %v1669_v34, %v1513_v13 }
 0x1af   :  { %v1386_v27 = vpop.f32.mrf.mxu0  ;;  %v1455_v12 = vpop.f32.mrf.mxu1 }
 0x1b0   :  { %v1387_v42 = vadd.f32 %v1386_v27, %v3211_v3 }
 0x1b1   :  { %v1520_v50 = vpop.f32.mrf.mxu2  ;;  %v1677_v10 = vpop.f32.mrf.mxu3 }
 0x1b2   :  { %v1521_v61 = vadd.f32 %v1520_v50, %v1448_v56  ;;  %v1452_v53 = vadd.f32 %v1451_v46, %v1387_v42 }
 0x1b4   :  { %v1674_v44 = vadd.f32 %v1673_v39, %v1521_v61 }
 0x1b7   :  { %v1390_v19 = vpop.f32.mrf.mxu0  ;;  %v3252_v22 = vpop.f32.mrf.mxu1 }
 0x1b8   :  { %v1391_v54 = vadd.f32 %v1390_v19, %v3219_v17 }
 0x1b9   :  { %v1528_v36 = vpop.f32.mrf.mxu2  ;;  %v3254_v21 = vpop.f32.mrf.mxu3 }
 0x1ba   :  { %v1529_v20 = vadd.f32 %v1528_v36, %v1452_v53  ;;  %v1456_v27 = vadd.f32 %v1455_v12, %v1391_v54 }
 0x1bc   :  { %v1678_v58 = vadd.f32 %v1677_v10, %v1529_v20 }
 0x1bf   :  { %v1394_v33 = vpop.f32.mrf.mxu0  ;;  %v3256_v48 = vpop.f32.mrf.mxu1 }
 0x1c0   :  { %v1395_v37 = vadd.f32 %v1394_v33, %v3227_v2 }
 0x1c1   :  { %v1536_v63 = vpop.f32.mrf.mxu2  ;;  %v3258_v47 = vpop.f32.mrf.mxu3 }
 0x1c2   :  { %v1537_v46 = vadd.f32 %v1536_v63, %v1456_v27  ;;  %v1460_v10 = vadd.f32 %v3252_v22, %v1395_v37 }
 0x1c4   :  { %v1682_v19 = vadd.f32 %v3254_v21, %v1537_v46 }
 0x1c7   :  { %v3260_v8 = vpop.f32.mrf.mxu0  ;;  %v3262_v38 = vpop.f32.mrf.mxu1 }
 0x1c8   :  { %v1399_v2 = vadd.f32 %v3260_v8, %v3235_v15 }
 0x1c9   :  { %v3264_v23 = vpop.f32.mrf.mxu2  ;;  %v3266_v49 = vpop.f32.mrf.mxu3 }
 0x1ca   :  { %v1545_v63 = vadd.f32 %v3264_v23, %v1460_v10  ;;  %v1464_v22 = vadd.f32 %v3256_v48, %v1399_v2 }
 0x1cc   :  { %v1686_v21 = vadd.f32 %v3258_v47, %v1545_v63 }
 0x1cf   :  { %v3268_v45 = vpop.f32.mrf.mxu0  ;;  %v3270_v16 = vpop.f32.mrf.mxu1 }
 0x1d0   :  { %v1403_v15 = vadd.f32 %v3268_v45, %v3243_v5 }
 0x1d1   :  { %v3272_v40 = vpop.f32.mrf.mxu2  ;;  %v3274_v6 = vpop.f32.mrf.mxu3 }
 0x1d2   :  { %v1553_v23 = vadd.f32 %v3272_v40, %v1464_v22  ;;  %v1468_v48 = vadd.f32 %v3262_v38, %v1403_v15 }
 0x1d4   :  { %v1690_v47 = vadd.f32 %v3266_v49, %v1553_v23 }
 0x1d7   :  { %v3276_v31 = vpop.f32.mrf.mxu0  ;;  %v1825_v9 = vpop.f32.mrf.mxu1 }
 0x1d8   :  { %v1407_v5 = vadd.f32 %v3276_v31, %v3249_v4 }
 0x1d9   :  { %v3279_v29 = vpop.f32.mrf.mxu2  ;;  %v3281_v41 = vpop.f32.mrf.mxu3 }
 0x1da   :  { %v1561_v40 = vadd.f32 %v3279_v29, %v1468_v48  ;;  %v1472_v38 = vadd.f32 %v3270_v16, %v1407_v5 }
 0x1dc   :  { %v1694_v49 = vadd.f32 %v3274_v6, %v1561_v40 }
 0x1df   :  { %v1751_v11 = vpop.f32.mrf.mxu0  ;;  %v1831_v51 = vpop.f32.mrf.mxu1 }
 0x1e0   :  { %v1752_v30 = vadd.f32 %v1751_v11, %v1670_v60 }
 0x1e1   :  { %v3284_v14 = vpop.f32.mrf.mxu2  ;;  %v2001_v59 = vpop.f32.mrf.mxu3 }
 0x1e2   :  { %v1826_v0 = vadd.f32 %v1825_v9, %v1752_v30  ;;  %v1569_v29 = vadd.f32 %v3284_v14, %v1472_v38 }
 0x1e7   :  { %v1756_v28 = vpop.f32.mrf.mxu0  ;;  %v1837_v7 = vpop.f32.mrf.mxu1 }
 0x1e8   :  { %v1757_v43 = vadd.f32 %v1756_v28, %v1674_v44 }
 0x1e9   :  { %v1936_v32 = vpop.f32.mrf.mxu2  ;;  %v2005_v18 = vpop.f32.mrf.mxu3 }
 0x1ea   :  { %v1937_v1 = vadd.f32 %v1936_v32, %v1826_v0  ;;  %v1832_v62 = vadd.f32 %v1831_v51, %v1757_v43 }
 0x1ec   :  { %v2002_v55 = vadd.f32 %v2001_v59, %v1937_v1 }
 0x1ee   :  { %vm2032_vm1 = vcmp.ge.f32.partialorder %v2002_v55, 0.0  ;;  %v2040_v25 = vmul.f32 0.1, %v2002_v55 }
 0x1ef   :  { %v1761_v35 = vpop.f32.mrf.mxu0  ;;  %v1843_v9 = vpop.f32.mrf.mxu1 }
 0x1f0   :  { %v2048_v57 = vsel %vm2032_vm1, %v2002_v55, %v2040_v25  ;;  %v1762_v39 = vadd.f32 %v1761_v35, %v1678_v58 }
 0x1f1   :  { %2056 = vst [vmem:[#allocation5] sm:$0xff] %v2048_v57  ;;  %v1940_v34 = vpop.f32.mrf.mxu2  ;;  %v2009_v3 = vpop.f32.mrf.mxu3 }
 0x1f2   :  { %v1941_v24 = vadd.f32 %v1940_v34, %v1832_v62  ;;  %v1838_v11 = vadd.f32 %v1837_v7, %v1762_v39 }
 0x1f4   :  { %v2006_v50 = vadd.f32 %v2005_v18, %v1941_v24 }
 0x1f6   :  { %vm2033_vm2 = vcmp.ge.f32.partialorder %v2006_v50, 0.0  ;;  %v2041_v26 = vmul.f32 0.1, %v2006_v50 }
 0x1f7   :  { %v1766_v36 = vpop.f32.mrf.mxu0  ;;  %v1849_v61 = vpop.f32.mrf.mxu1 }
 0x1f8   :  { %v2049_v13 = vsel %vm2033_vm2, %v2006_v50, %v2041_v26  ;;  %v1767_v12 = vadd.f32 %v1766_v36, %v1682_v19 }
 0x1f9   :  { %2057 = vst [vmem:[#allocation5 + $0x8] sm:$0xff] %v2049_v13  ;;  %v1944_v17 = vpop.f32.mrf.mxu2  ;;  %v2013_v59 = vpop.f32.mrf.mxu3 }
 0x1fa   :  { %v1945_v52 = vadd.f32 %v1944_v17, %v1838_v11  ;;  %v1844_v30 = vadd.f32 %v1843_v9, %v1767_v12  ;;  %v1698_v9 = vadd.f32 %v3281_v41, %v1569_v29 }
 0x1fc   :  { %v2010_v60 = vadd.f32 %v2009_v3, %v1945_v52 }
 0x1fe   :  { %vm2034_vm3 = vcmp.ge.f32.partialorder %v2010_v60, 0.0  ;;  %v2042_v51 = vmul.f32 0.1, %v2010_v60 }
 0x1ff   :  { %v1771_v56 = vpop.f32.mrf.mxu0  ;;  %v1855_v7 = vpop.f32.mrf.mxu1 }
 0x200   :  { %v2050_v33 = vsel %vm2034_vm3, %v2010_v60, %v2042_v51  ;;  %v1772_v0 = vadd.f32 %v1771_v56, %v1686_v21 }
 0x201   :  { %2058 = vst [vmem:[#allocation5 + $0x10] sm:$0xff] %v2050_v33  ;;  %v1948_v28 = vpop.f32.mrf.mxu2  ;;  %v2017_v18 = vpop.f32.mrf.mxu3 }
 0x202   :  { %v1949_v42 = vadd.f32 %v1948_v28, %v1844_v30  ;;  %v1850_v53 = vadd.f32 %v1849_v61, %v1772_v0 }
 0x204   :  { %v2014_v32 = vadd.f32 %v2013_v59, %v1949_v42 }
 0x206   :  { %vm2035_vm4 = vcmp.ge.f32.partialorder %v2014_v32, 0.0  ;;  %v2043_v44 = vmul.f32 0.1, %v2014_v32 }
 0x207   :  { %v1776_v1 = vpop.f32.mrf.mxu0  ;;  %v1861_v27 = vpop.f32.mrf.mxu1 }
 0x208   :  { %v2051_v8 = vsel %vm2035_vm4, %v2014_v32, %v2043_v44  ;;  %v1777_v20 = vadd.f32 %v1776_v1, %v1690_v47 }
 0x209   :  { %2059 = vst [vmem:[#allocation5 + $0x18] sm:$0xff] %v2051_v8  ;;  %v1952_v43 = vpop.f32.mrf.mxu2  ;;  %v2021_v54 = vpop.f32.mrf.mxu3 }
 0x20a   :  { %v1953_v55 = vadd.f32 %v1952_v43, %v1850_v53  ;;  %v1856_v62 = vadd.f32 %v1855_v7, %v1777_v20 }
 0x20c   :  { %v2018_v25 = vadd.f32 %v2017_v18, %v1953_v55 }
 0x20e   :  { %vm2036_vm5 = vcmp.ge.f32.partialorder %v2018_v25, 0.0  ;;  %v2044_v35 = vmul.f32 0.1, %v2018_v25 }
 0x20f   :  { %v1781_v57 = vpop.f32.mrf.mxu0  ;;  %v1867_v13 = vpop.f32.mrf.mxu1 }
 0x210   :  { %v2052_v45 = vsel %vm2036_vm5, %v2018_v25, %v2044_v35  ;;  %v1782_v58 = vadd.f32 %v1781_v57, %v1694_v49 }
 0x211   :  { %2060 = vst [vmem:[#allocation5 + $0x20] sm:$0xff] %v2052_v45  ;;  %v1956_v34 = vpop.f32.mrf.mxu2  ;;  %v2025_v46 = vpop.f32.mrf.mxu3 }
 0x212   :  { %v1957_v3 = vadd.f32 %v1956_v34, %v1856_v62  ;;  %v1862_v26 = vadd.f32 %v1861_v27, %v1782_v58 }
 0x214   :  { %v2022_v24 = vadd.f32 %v2021_v54, %v1957_v3 }
 0x216   :  { %vm2037_vm6 = vcmp.ge.f32.partialorder %v2022_v24, 0.0  ;;  %v2045_v39 = vmul.f32 0.1, %v2022_v24 }
 0x217   :  { %v1786_v4 = vpop.f32.mrf.mxu0 }
 0x218   :  { %v2053_v50 = vsel %vm2037_vm6, %v2022_v24, %v2045_v39  ;;  %v1787_v6 = vadd.f32 %v1786_v4, %v1698_v9 }
 0x219   :  { %2061 = vst [vmem:[#allocation5 + $0x28] sm:$0xff] %v2053_v50  ;;  %v1960_v31 = vpop.f32.mrf.mxu2  ;;  %v2029_v52 = vpop.f32.mrf.mxu3 }
 0x21a   :  { %v1961_v36 = vadd.f32 %v1960_v31, %v1862_v26  ;;  %v1868_v17 = vadd.f32 %v1867_v13, %v1787_v6 }
 0x21c   :  { %v2026_v37 = vadd.f32 %v2025_v46, %v1961_v36 }
 0x21e   :  { %vm2038_vm7 = vcmp.ge.f32.partialorder %v2026_v37, 0.0  ;;  %v2046_v16 = vmul.f32 0.1, %v2026_v37 }
 0x220   :  { %v2054_v11 = vsel %vm2038_vm7, %v2026_v37, %v2046_v16 }
 0x221   :  { %2062 = vst [vmem:[#allocation5 + $0x30] sm:$0xff] %v2054_v11  ;;  %v1964_v14 = vpop.f32.mrf.mxu2 }
 0x222   :  { %v1965_v19 = vadd.f32 %v1964_v14, %v1868_v17 }
 0x224   :  { %v2030_v59 = vadd.f32 %v2029_v52, %v1965_v19 }
 0x226   :  { %vm2039_vm8 = vcmp.ge.f32.partialorder %v2030_v59, 0.0  ;;  %v2047_v41 = vmul.f32 0.1, %v2030_v59 }
 0x228   :  { %v2055_v10 = vsel %vm2039_vm8, %v2030_v59, %v2047_v41 }
 0x229   :  { %2063 = vst [vmem:[#allocation5 + $0x38] sm:$0xff] %v2055_v10 }
 0x22a   :  { %2076 = dma.vmem_to_hbm [thread:$0]  %s2069_s26, 1024, %s2071_s3, [#allocation4], %s2141_s23, %s2141_s23, %s2142_s24  }
 0x22b   :  { %2138 = dma.done.wait [#allocation4], 1024  }
 0x22c   :  { %2139 = vsyncadd [#allocation4], 4294966272 }
 0x22d   :  { %2081 = vsyncpa [#allocation3], 1 }
 0x22e   :  { %2082 = vsyncpa [#allocation4], 1 }

</bundles_post_ra>
